<compile_context>
chip_gen: v6e
topology: v6e:2x2x1
jax: 0.10.0
libtpu: 0.0.40
codegen_flags: <defaults>
</compile_context>

<pallas_src>
from functools import partial, reduce
from operator import mul

import jax
import jax.numpy as jnp
from jax.experimental import pallas as pl
from jax.experimental.pallas import tpu as pltpu


_LANE = 128
_SUBLANE = 8


def _round_up(x, m):
    return ((x + m - 1) // m) * m


def _vmem_budget_bytes():
    """Generation-aware usable-VMEM budget (leaves headroom for compiler scratch)."""
    try:
        info = pltpu.get_tpu_info()
        cap = int(getattr(info, "vmem_capacity_bytes", 64 << 20))
    except Exception:
        cap = 64 << 20  # conservative (v7x per-core VMEM)
    return int(cap * 0.82)


def _fused_mlp_kernel(*refs, n_layers, activation):
    """Entire MLP on one batch tile, fully resident in VMEM.

    refs = (x_ref, w0, b0, w1, b1, ..., w_{L-1}, b_{L-1}, o_ref)
    Weights are pre-transposed to (in_pad, out_pad), so each layer is a direct MXU matmul.
    """
    x_ref = refs[0]
    o_ref = refs[-1]
    p_refs = refs[1:-1]

    h = x_ref[...]
    for i in range(n_layers):
        w = p_refs[2 * i][...]          # (N_in_pad, N_out_pad), f32 or bf16
        b = p_refs[2 * i + 1][...]      # (1, N_out_pad), f32
        lhs = h if h.dtype == w.dtype else h.astype(w.dtype)
        h = jnp.dot(lhs, w, preferred_element_type=jnp.float32) + b
        if i < n_layers - 1:            # activation after every hidden Linear (VPU/EUP)
            if activation == "relu":
                h = jnp.maximum(h, 0.0)
            elif activation == "leakyrelu":
                h = jnp.where(h > 0, h, 0.01 * h)
            elif activation == "elu":
                h = jnp.where(h > 0, h, jnp.exp(h) - 1.0)
            elif activation == "tanh":
                h = jnp.tanh(h)
    o_ref[...] = h.astype(o_ref.dtype)


def prepare_mlpcob_params(params, num_classes, *, use_bf16=False, activation="relu"):
    """One-time prep: zero-pad every feature dim to a multiple of 128 lanes and
    pre-transpose weights to (in_pad, out_pad). Zero padding is exact."""
    w_dtype = jnp.bfloat16 if use_bf16 else jnp.float32
    ws, bs = [], []
    for w, b in params:
        n_out, n_in = w.shape
        n_out_p = _round_up(n_out, _LANE)
        n_in_p = _round_up(n_in, _LANE)
        w_pad = jnp.pad(w.astype(jnp.float32),
                        ((0, n_out_p - n_out), (0, n_in_p - n_in)))
        ws.append(jnp.transpose(w_pad).astype(w_dtype))            # (in_pad, out_pad)
        bs.append(jnp.pad(b.astype(jnp.float32),
                          (0, n_out_p - n_out)).reshape(1, n_out_p))
    return {
        "weights": ws,
        "biases": bs,
        "num_classes": num_classes,
        "in_features": params[0][0].shape[1],
        "activation": activation,
    }


def mlpcob_forward(x_nchw, prepared, *, tm=256):
    """Forward pass matching MLPCOB: Flatten -> (Linear+act)*H -> Linear, one pallas_call."""
    ws, bs = prepared["weights"], prepared["biases"]
    num_classes = prepared["num_classes"]
    in_features = prepared["in_features"]
    activation = prepared["activation"]
    n_layers = len(ws)

    in_pad = ws[0].shape[0]
    out_pad = ws[-1].shape[1]

    B = x_nchw.shape[0]
    x = x_nchw.reshape(B, -1).astype(jnp.float32)   # FlattenCOB (row-major, like torch)
    assert x.shape[1] == in_features, (x.shape, in_features)

    budget = _vmem_budget_bytes()
    param_bytes = sum(w.size * w.dtype.itemsize + b.size * b.dtype.itemsize
                      for w, b in zip(ws, bs))

    # Clamp the batch tile (multiple of 8) to what the VMEM budget allows:
    # double-buffered x tile + double-buffered out tile + ~2 live f32 intermediates.
    max_width = max([in_pad] + [w.shape[1] for w in ws])
    per_row_bytes = 4 * (2 * in_pad + 2 * out_pad + 2 * max_width)
    headroom = 8 << 20
    avail = max(budget - param_bytes - headroom, per_row_bytes * _SUBLANE)
    tm_cap = max(_SUBLANE, (avail // per_row_bytes) // _SUBLANE * _SUBLANE)

    tm = _round_up(max(int(tm), 1), _SUBLANE)
    tm = max(_SUBLANE, min(tm, _round_up(B, _SUBLANE), tm_cap))

    m_pad = _round_up(B, tm)
    if m_pad == B and in_pad == in_features:
        x_pad = x                                     # no wrapper-side pad copy needed
    else:
        x_pad = jnp.pad(x, ((0, m_pad - B), (0, in_pad - in_features)))

    grid = (m_pad // tm,)
    flat_params = [r for pair in zip(ws, bs) for r in pair]

    def _run(single_buffer_params):
        in_specs = [pl.BlockSpec((tm, in_pad), lambda i: (i, 0))]
        for w, b in zip(ws, bs):
            if single_buffer_params:
                in_specs.append(pl.BlockSpec(w.shape, lambda i: (0, 0),
                                             pipeline_mode=pl.Buffered(1)))
                in_specs.append(pl.BlockSpec(b.shape, lambda i: (0, 0),
                                             pipeline_mode=pl.Buffered(1)))
            else:
                in_specs.append(pl.BlockSpec(w.shape, lambda i: (0, 0)))
                in_specs.append(pl.BlockSpec(b.shape, lambda i: (0, 0)))

        param_footprint = param_bytes * (1 if single_buffer_params else 2)
        est = (param_footprint
               + 4 * (2 * tm * in_pad + 2 * tm * out_pad + 2 * tm * max_width)
               + (8 << 20))
        vmem_limit = min(max(est, 32 << 20), budget)

        return pl.pallas_call(
            partial(_fused_mlp_kernel, n_layers=n_layers, activation=activation),
            out_shape=jax.ShapeDtypeStruct((m_pad, out_pad), jnp.float32),
            grid_spec=pltpu.PrefetchScalarGridSpec(
                num_scalar_prefetch=0,
                grid=grid,
                in_specs=in_specs,
                out_specs=pl.BlockSpec((tm, out_pad), lambda i: (i, 0)),
            ),
            compiler_params=pltpu.CompilerParams(
                dimension_semantics=("parallel",),   # batch tiles shard across TCs on v7x
                vmem_limit_bytes=int(vmem_limit),
            ),
        )(x_pad, *flat_params)

    try:
        out_full = _run(True)
    except Exception:
        # Fallback if this JAX build rejects single-buffered (Buffered(1)) param specs.
        out_full = _run(False)

    return out_full[:B, :num_classes]


def init_mlpcob_params(key, input_shape, num_classes, hidden_layers):
    """Deterministic synthetic parameters with the same shapes as the PyTorch module."""
    in_dim = reduce(mul, input_shape)
    layers_dim = (in_dim,) + tuple(hidden_layers) + (num_classes,)
    params = []
    for i in range(len(layers_dim) - 1):
        fan_in, fan_out = layers_dim[i], layers_dim[i + 1]
        key, kw, kb = jax.random.split(key, 3)
        bound = 1.0 / jnp.sqrt(jnp.float32(fan_in))
        w = jax.random.uniform(kw, (fan_out, fan_in), jnp.float32, -bound, bound)
        b = jax.random.uniform(kb, (fan_out,), jnp.float32, -bound, bound)
        params.append((w, b))
    return params


if __name__ == "__main__":
    # Small shapes consistent with the module: input_shape=(4, 16, 16) -> flattened 1024,
    # 5 hidden layers of 32 units, 10 classes, batch 2.
    input_shape = (4, 16, 16)
    num_classes = 10
    hidden_layers = (32, 32, 32, 32, 32)
    batch = 2

    key = jax.random.PRNGKey(0)
    key, kx = jax.random.split(key)
    x = jax.random.normal(kx, (batch,) + input_shape, dtype=jnp.float32)

    params = init_mlpcob_params(key, input_shape, num_classes, hidden_layers)
    prepared = prepare_mlpcob_params(params, num_classes)   # one-time pad + transpose

    out = mlpcob_forward(x, prepared)
    out = jax.block_until_ready(out)

    # Pure-JAX reference check (glue-level, not part of the kernel hot path).
    h = x.reshape(batch, -1)
    for i, (w, b) in enumerate(params):
        h = h @ w.T + b
        if i < len(params) - 1:
            h = jnp.maximum(h, 0.0)
    assert out.shape == (batch, num_classes), out.shape
    assert jnp.allclose(out, h, atol=1e-4, rtol=1e-4)

    print("KERNEL_OK")
</pallas_src>

<mosaic_0001>
module attributes {stable_mosaic.version = 11 : i64} {
  func.func @_fused_mlp_kernel(%arg0: i32, %arg1: memref<8x1024xf32, #tpu.memory_space<vmem>>, %arg2: memref<1024x128xf32, #tpu.memory_space<vmem>>, %arg3: memref<1x128xf32, #tpu.memory_space<vmem>>, %arg4: memref<128x128xf32, #tpu.memory_space<vmem>>, %arg5: memref<1x128xf32, #tpu.memory_space<vmem>>, %arg6: memref<128x128xf32, #tpu.memory_space<vmem>>, %arg7: memref<1x128xf32, #tpu.memory_space<vmem>>, %arg8: memref<128x128xf32, #tpu.memory_space<vmem>>, %arg9: memref<1x128xf32, #tpu.memory_space<vmem>>, %arg10: memref<128x128xf32, #tpu.memory_space<vmem>>, %arg11: memref<1x128xf32, #tpu.memory_space<vmem>>, %arg12: memref<128x128xf32, #tpu.memory_space<vmem>>, %arg13: memref<1x128xf32, #tpu.memory_space<vmem>>, %arg14: memref<8x128xf32, #tpu.memory_space<vmem>>) attributes {dimension_semantics = [#tpu.dimension_semantics<parallel>], iteration_bounds = array<i64: 1>, scalar_prefetch = 0 : i64, scratch_operands = 0 : i64, tpu.core_type = #tpu.core_type<tc>, window_params = [{transform_indices = @transform_0, window_bounds = array<i64: 8, 1024>}, {pipeline_mode = #tpu.pipeline_mode<synchronous>, transform_indices = @transform_1, window_bounds = array<i64: 1024, 128>}, {pipeline_mode = #tpu.pipeline_mode<synchronous>, transform_indices = @transform_2, window_bounds = array<i64: 1, 128>}, {pipeline_mode = #tpu.pipeline_mode<synchronous>, transform_indices = @transform_3, window_bounds = array<i64: 128, 128>}, {pipeline_mode = #tpu.pipeline_mode<synchronous>, transform_indices = @transform_4, window_bounds = array<i64: 1, 128>}, {pipeline_mode = #tpu.pipeline_mode<synchronous>, transform_indices = @transform_5, window_bounds = array<i64: 128, 128>}, {pipeline_mode = #tpu.pipeline_mode<synchronous>, transform_indices = @transform_6, window_bounds = array<i64: 1, 128>}, {pipeline_mode = #tpu.pipeline_mode<synchronous>, transform_indices = @transform_7, window_bounds = array<i64: 128, 128>}, {pipeline_mode = #tpu.pipeline_mode<synchronous>, transform_indices = @transform_8, window_bounds = array<i64: 1, 128>}, {pipeline_mode = #tpu.pipeline_mode<synchronous>, transform_indices = @transform_9, window_bounds = array<i64: 128, 128>}, {pipeline_mode = #tpu.pipeline_mode<synchronous>, transform_indices = @transform_10, window_bounds = array<i64: 1, 128>}, {pipeline_mode = #tpu.pipeline_mode<synchronous>, transform_indices = @transform_11, window_bounds = array<i64: 128, 128>}, {pipeline_mode = #tpu.pipeline_mode<synchronous>, transform_indices = @transform_12, window_bounds = array<i64: 1, 128>}, {transform_indices = @transform_13, window_bounds = array<i64: 8, 128>}]} {
    %c0 = arith.constant 0 : index
    %c0_0 = arith.constant 0 : index
    %0 = vector.load %arg1[%c0, %c0_0] : memref<8x1024xf32, #tpu.memory_space<vmem>>, vector<8x1024xf32>
    %c0_1 = arith.constant 0 : index
    %c0_2 = arith.constant 0 : index
    %1 = vector.load %arg2[%c0_1, %c0_2] : memref<1024x128xf32, #tpu.memory_space<vmem>>, vector<1024x128xf32>
    %c0_3 = arith.constant 0 : index
    %c0_4 = arith.constant 0 : index
    %2 = vector.load %arg3[%c0_3, %c0_4] : memref<1x128xf32, #tpu.memory_space<vmem>>, vector<1x128xf32>
    %cst = arith.constant dense<0.000000e+00> : vector<8x128xf32>
    %3 = tpu.matmul %0, %1, %cst {dimension_numbers = #tpu.dot_dimension_numbers<[1], [0], [0], [1], [0, 0, 1, 1], [], []>} : vector<8x1024xf32>, vector<1024x128xf32>, vector<8x128xf32> -> vector<8x128xf32>
    %4 = vector.broadcast %2 : vector<1x128xf32> to vector<8x128xf32>
    %5 = arith.addf %3, %4 : vector<8x128xf32>
    %cst_5 = arith.constant 0.000000e+00 : f32
    %6 = vector.broadcast %cst_5 : f32 to vector<8x128xf32>
    %7 = arith.maximumf %5, %6 : vector<8x128xf32>
    %c0_6 = arith.constant 0 : index
    %c0_7 = arith.constant 0 : index
    %8 = vector.load %arg4[%c0_6, %c0_7] : memref<128x128xf32, #tpu.memory_space<vmem>>, vector<128x128xf32>
    %c0_8 = arith.constant 0 : index
    %c0_9 = arith.constant 0 : index
    %9 = vector.load %arg5[%c0_8, %c0_9] : memref<1x128xf32, #tpu.memory_space<vmem>>, vector<1x128xf32>
    %cst_10 = arith.constant dense<0.000000e+00> : vector<8x128xf32>
    %10 = tpu.matmul %7, %8, %cst_10 {dimension_numbers = #tpu.dot_dimension_numbers<[1], [0], [0], [1], [0, 0, 1, 1], [], []>} : vector<8x128xf32>, vector<128x128xf32>, vector<8x128xf32> -> vector<8x128xf32>
    %11 = vector.broadcast %9 : vector<1x128xf32> to vector<8x128xf32>
    %12 = arith.addf %10, %11 : vector<8x128xf32>
    %cst_11 = arith.constant 0.000000e+00 : f32
    %13 = vector.broadcast %cst_11 : f32 to vector<8x128xf32>
    %14 = arith.maximumf %12, %13 : vector<8x128xf32>
    %c0_12 = arith.constant 0 : index
    %c0_13 = arith.constant 0 : index
    %15 = vector.load %arg6[%c0_12, %c0_13] : memref<128x128xf32, #tpu.memory_space<vmem>>, vector<128x128xf32>
    %c0_14 = arith.constant 0 : index
    %c0_15 = arith.constant 0 : index
    %16 = vector.load %arg7[%c0_14, %c0_15] : memref<1x128xf32, #tpu.memory_space<vmem>>, vector<1x128xf32>
    %cst_16 = arith.constant dense<0.000000e+00> : vector<8x128xf32>
    %17 = tpu.matmul %14, %15, %cst_16 {dimension_numbers = #tpu.dot_dimension_numbers<[1], [0], [0], [1], [0, 0, 1, 1], [], []>} : vector<8x128xf32>, vector<128x128xf32>, vector<8x128xf32> -> vector<8x128xf32>
    %18 = vector.broadcast %16 : vector<1x128xf32> to vector<8x128xf32>
    %19 = arith.addf %17, %18 : vector<8x128xf32>
    %cst_17 = arith.constant 0.000000e+00 : f32
    %20 = vector.broadcast %cst_17 : f32 to vector<8x128xf32>
    %21 = arith.maximumf %19, %20 : vector<8x128xf32>
    %c0_18 = arith.constant 0 : index
    %c0_19 = arith.constant 0 : index
    %22 = vector.load %arg8[%c0_18, %c0_19] : memref<128x128xf32, #tpu.memory_space<vmem>>, vector<128x128xf32>
    %c0_20 = arith.constant 0 : index
    %c0_21 = arith.constant 0 : index
    %23 = vector.load %arg9[%c0_20, %c0_21] : memref<1x128xf32, #tpu.memory_space<vmem>>, vector<1x128xf32>
    %cst_22 = arith.constant dense<0.000000e+00> : vector<8x128xf32>
    %24 = tpu.matmul %21, %22, %cst_22 {dimension_numbers = #tpu.dot_dimension_numbers<[1], [0], [0], [1], [0, 0, 1, 1], [], []>} : vector<8x128xf32>, vector<128x128xf32>, vector<8x128xf32> -> vector<8x128xf32>
    %25 = vector.broadcast %23 : vector<1x128xf32> to vector<8x128xf32>
    %26 = arith.addf %24, %25 : vector<8x128xf32>
    %cst_23 = arith.constant 0.000000e+00 : f32
    %27 = vector.broadcast %cst_23 : f32 to vector<8x128xf32>
    %28 = arith.maximumf %26, %27 : vector<8x128xf32>
    %c0_24 = arith.constant 0 : index
    %c0_25 = arith.constant 0 : index
    %29 = vector.load %arg10[%c0_24, %c0_25] : memref<128x128xf32, #tpu.memory_space<vmem>>, vector<128x128xf32>
    %c0_26 = arith.constant 0 : index
    %c0_27 = arith.constant 0 : index
    %30 = vector.load %arg11[%c0_26, %c0_27] : memref<1x128xf32, #tpu.memory_space<vmem>>, vector<1x128xf32>
    %cst_28 = arith.constant dense<0.000000e+00> : vector<8x128xf32>
    %31 = tpu.matmul %28, %29, %cst_28 {dimension_numbers = #tpu.dot_dimension_numbers<[1], [0], [0], [1], [0, 0, 1, 1], [], []>} : vector<8x128xf32>, vector<128x128xf32>, vector<8x128xf32> -> vector<8x128xf32>
    %32 = vector.broadcast %30 : vector<1x128xf32> to vector<8x128xf32>
    %33 = arith.addf %31, %32 : vector<8x128xf32>
    %cst_29 = arith.constant 0.000000e+00 : f32
    %34 = vector.broadcast %cst_29 : f32 to vector<8x128xf32>
    %35 = arith.maximumf %33, %34 : vector<8x128xf32>
    %c0_30 = arith.constant 0 : index
    %c0_31 = arith.constant 0 : index
    %36 = vector.load %arg12[%c0_30, %c0_31] : memref<128x128xf32, #tpu.memory_space<vmem>>, vector<128x128xf32>
    %c0_32 = arith.constant 0 : index
    %c0_33 = arith.constant 0 : index
    %37 = vector.load %arg13[%c0_32, %c0_33] : memref<1x128xf32, #tpu.memory_space<vmem>>, vector<1x128xf32>
    %cst_34 = arith.constant dense<0.000000e+00> : vector<8x128xf32>
    %38 = tpu.matmul %35, %36, %cst_34 {dimension_numbers = #tpu.dot_dimension_numbers<[1], [0], [0], [1], [0, 0, 1, 1], [], []>} : vector<8x128xf32>, vector<128x128xf32>, vector<8x128xf32> -> vector<8x128xf32>
    %39 = vector.broadcast %37 : vector<1x128xf32> to vector<8x128xf32>
    %40 = arith.addf %38, %39 : vector<8x128xf32>
    %c0_35 = arith.constant 0 : index
    %c0_36 = arith.constant 0 : index
    %41 = vector.load %arg14[%c0_35, %c0_36] : memref<8x128xf32, #tpu.memory_space<vmem>>, vector<8x128xf32>
    tpu.vector_store %arg14[%c0_35, %c0_36], %40 {strides = array<i32>} : memref<8x128xf32, #tpu.memory_space<vmem>>, vector<8x128xf32>,
    return
  }
  func.func @transform_0(%arg0: i32) -> (i32, i32) {
    %c0_i32 = arith.constant 0 : i32
    %c0_i32_0 = arith.constant 0 : i32
    return %arg0, %c0_i32 : i32, i32
  }
  func.func @transform_1(%arg0: i32) -> (i32, i32) {
    %c0_i32 = arith.constant 0 : i32
    %c0_i32_0 = arith.constant 0 : i32
    %c0_i32_1 = arith.constant 0 : i32
    return %c0_i32, %c0_i32_0 : i32, i32
  }
  func.func @transform_2(%arg0: i32) -> (i32, i32) {
    %c0_i32 = arith.constant 0 : i32
    %c0_i32_0 = arith.constant 0 : i32
    %c0_i32_1 = arith.constant 0 : i32
    return %c0_i32, %c0_i32_0 : i32, i32
  }
  func.func @transform_3(%arg0: i32) -> (i32, i32) {
    %c0_i32 = arith.constant 0 : i32
    %c0_i32_0 = arith.constant 0 : i32
    %c0_i32_1 = arith.constant 0 : i32
    return %c0_i32, %c0_i32_0 : i32, i32
  }
  func.func @transform_4(%arg0: i32) -> (i32, i32) {
    %c0_i32 = arith.constant 0 : i32
    %c0_i32_0 = arith.constant 0 : i32
    %c0_i32_1 = arith.constant 0 : i32
    return %c0_i32, %c0_i32_0 : i32, i32
  }
  func.func @transform_5(%arg0: i32) -> (i32, i32) {
    %c0_i32 = arith.constant 0 : i32
    %c0_i32_0 = arith.constant 0 : i32
    %c0_i32_1 = arith.constant 0 : i32
    return %c0_i32, %c0_i32_0 : i32, i32
  }
  func.func @transform_6(%arg0: i32) -> (i32, i32) {
    %c0_i32 = arith.constant 0 : i32
    %c0_i32_0 = arith.constant 0 : i32
    %c0_i32_1 = arith.constant 0 : i32
    return %c0_i32, %c0_i32_0 : i32, i32
  }
  func.func @transform_7(%arg0: i32) -> (i32, i32) {
    %c0_i32 = arith.constant 0 : i32
    %c0_i32_0 = arith.constant 0 : i32
    %c0_i32_1 = arith.constant 0 : i32
    return %c0_i32, %c0_i32_0 : i32, i32
  }
  func.func @transform_8(%arg0: i32) -> (i32, i32) {
    %c0_i32 = arith.constant 0 : i32
    %c0_i32_0 = arith.constant 0 : i32
    %c0_i32_1 = arith.constant 0 : i32
    return %c0_i32, %c0_i32_0 : i32, i32
  }
  func.func @transform_9(%arg0: i32) -> (i32, i32) {
    %c0_i32 = arith.constant 0 : i32
    %c0_i32_0 = arith.constant 0 : i32
    %c0_i32_1 = arith.constant 0 : i32
    return %c0_i32, %c0_i32_0 : i32, i32
  }
  func.func @transform_10(%arg0: i32) -> (i32, i32) {
    %c0_i32 = arith.constant 0 : i32
    %c0_i32_0 = arith.constant 0 : i32
    %c0_i32_1 = arith.constant 0 : i32
    return %c0_i32, %c0_i32_0 : i32, i32
  }
  func.func @transform_11(%arg0: i32) -> (i32, i32) {
    %c0_i32 = arith.constant 0 : i32
    %c0_i32_0 = arith.constant 0 : i32
    %c0_i32_1 = arith.constant 0 : i32
    return %c0_i32, %c0_i32_0 : i32, i32
  }
  func.func @transform_12(%arg0: i32) -> (i32, i32) {
    %c0_i32 = arith.constant 0 : i32
    %c0_i32_0 = arith.constant 0 : i32
    %c0_i32_1 = arith.constant 0 : i32
    return %c0_i32, %c0_i32_0 : i32, i32
  }
  func.func @transform_13(%arg0: i32) -> (i32, i32) {
    %c0_i32 = arith.constant 0 : i32
    %c0_i32_0 = arith.constant 0 : i32
    return %arg0, %c0_i32 : i32, i32
  }
}

module attributes {stable_mosaic.version = 11 : i64} {
  func.func @_fused_mlp_kernel(%arg0: i32, %arg1: memref<8x1024xf32, #tpu.memory_space<vmem>>, %arg2: memref<1024x128xf32, #tpu.memory_space<vmem>>, %arg3: memref<1x128xf32, #tpu.memory_space<vmem>>, %arg4: memref<128x128xf32, #tpu.memory_space<vmem>>, %arg5: memref<1x128xf32, #tpu.memory_space<vmem>>, %arg6: memref<128x128xf32, #tpu.memory_space<vmem>>, %arg7: memref<1x128xf32, #tpu.memory_space<vmem>>, %arg8: memref<128x128xf32, #tpu.memory_space<vmem>>, %arg9: memref<1x128xf32, #tpu.memory_space<vmem>>, %arg10: memref<128x128xf32, #tpu.memory_space<vmem>>, %arg11: memref<1x128xf32, #tpu.memory_space<vmem>>, %arg12: memref<128x128xf32, #tpu.memory_space<vmem>>, %arg13: memref<1x128xf32, #tpu.memory_space<vmem>>, %arg14: memref<8x128xf32, #tpu.memory_space<vmem>>) attributes {dimension_semantics = [#tpu.dimension_semantics<parallel>], iteration_bounds = array<i64: 1>, scalar_prefetch = 0 : i64, scratch_operands = 0 : i64, tpu.core_type = #tpu.core_type<tc>, window_params = [{transform_indices = @transform_0, window_bounds = array<i64: 8, 1024>}, {pipeline_mode = #tpu.pipeline_mode<synchronous>, transform_indices = @transform_1, window_bounds = array<i64: 1024, 128>}, {pipeline_mode = #tpu.pipeline_mode<synchronous>, transform_indices = @transform_2, window_bounds = array<i64: 1, 128>}, {pipeline_mode = #tpu.pipeline_mode<synchronous>, transform_indices = @transform_3, window_bounds = array<i64: 128, 128>}, {pipeline_mode = #tpu.pipeline_mode<synchronous>, transform_indices = @transform_4, window_bounds = array<i64: 1, 128>}, {pipeline_mode = #tpu.pipeline_mode<synchronous>, transform_indices = @transform_5, window_bounds = array<i64: 128, 128>}, {pipeline_mode = #tpu.pipeline_mode<synchronous>, transform_indices = @transform_6, window_bounds = array<i64: 1, 128>}, {pipeline_mode = #tpu.pipeline_mode<synchronous>, transform_indices = @transform_7, window_bounds = array<i64: 128, 128>}, {pipeline_mode = #tpu.pipeline_mode<synchronous>, transform_indices = @transform_8, window_bounds = array<i64: 1, 128>}, {pipeline_mode = #tpu.pipeline_mode<synchronous>, transform_indices = @transform_9, window_bounds = array<i64: 128, 128>}, {pipeline_mode = #tpu.pipeline_mode<synchronous>, transform_indices = @transform_10, window_bounds = array<i64: 1, 128>}, {pipeline_mode = #tpu.pipeline_mode<synchronous>, transform_indices = @transform_11, window_bounds = array<i64: 128, 128>}, {pipeline_mode = #tpu.pipeline_mode<synchronous>, transform_indices = @transform_12, window_bounds = array<i64: 1, 128>}, {transform_indices = @transform_13, window_bounds = array<i64: 8, 128>}]} {
    %c0 = arith.constant 0 : index
    %c0_0 = arith.constant 0 : index
    %0 = vector.load %arg1[%c0, %c0_0] : memref<8x1024xf32, #tpu.memory_space<vmem>>, vector<8x1024xf32>
    %c0_1 = arith.constant 0 : index
    %c0_2 = arith.constant 0 : index
    %1 = vector.load %arg2[%c0_1, %c0_2] : memref<1024x128xf32, #tpu.memory_space<vmem>>, vector<1024x128xf32>
    %c0_3 = arith.constant 0 : index
    %c0_4 = arith.constant 0 : index
    %2 = vector.load %arg3[%c0_3, %c0_4] : memref<1x128xf32, #tpu.memory_space<vmem>>, vector<1x128xf32>
    %cst = arith.constant dense<0.000000e+00> : vector<8x128xf32>
    %3 = tpu.matmul %0, %1, %cst {dimension_numbers = #tpu.dot_dimension_numbers<[1], [0], [0], [1], [0, 0, 1, 1], [], []>} : vector<8x1024xf32>, vector<1024x128xf32>, vector<8x128xf32> -> vector<8x128xf32>
    %4 = vector.broadcast %2 : vector<1x128xf32> to vector<8x128xf32>
    %5 = arith.addf %3, %4 : vector<8x128xf32>
    %cst_5 = arith.constant 0.000000e+00 : f32
    %6 = vector.broadcast %cst_5 : f32 to vector<8x128xf32>
    %7 = arith.maximumf %5, %6 : vector<8x128xf32>
    %c0_6 = arith.constant 0 : index
    %c0_7 = arith.constant 0 : index
    %8 = vector.load %arg4[%c0_6, %c0_7] : memref<128x128xf32, #tpu.memory_space<vmem>>, vector<128x128xf32>
    %c0_8 = arith.constant 0 : index
    %c0_9 = arith.constant 0 : index
    %9 = vector.load %arg5[%c0_8, %c0_9] : memref<1x128xf32, #tpu.memory_space<vmem>>, vector<1x128xf32>
    %cst_10 = arith.constant dense<0.000000e+00> : vector<8x128xf32>
    %10 = tpu.matmul %7, %8, %cst_10 {dimension_numbers = #tpu.dot_dimension_numbers<[1], [0], [0], [1], [0, 0, 1, 1], [], []>} : vector<8x128xf32>, vector<128x128xf32>, vector<8x128xf32> -> vector<8x128xf32>
    %11 = vector.broadcast %9 : vector<1x128xf32> to vector<8x128xf32>
    %12 = arith.addf %10, %11 : vector<8x128xf32>
    %cst_11 = arith.constant 0.000000e+00 : f32
    %13 = vector.broadcast %cst_11 : f32 to vector<8x128xf32>
    %14 = arith.maximumf %12, %13 : vector<8x128xf32>
    %c0_12 = arith.constant 0 : index
    %c0_13 = arith.constant 0 : index
    %15 = vector.load %arg6[%c0_12, %c0_13] : memref<128x128xf32, #tpu.memory_space<vmem>>, vector<128x128xf32>
    %c0_14 = arith.constant 0 : index
    %c0_15 = arith.constant 0 : index
    %16 = vector.load %arg7[%c0_14, %c0_15] : memref<1x128xf32, #tpu.memory_space<vmem>>, vector<1x128xf32>
    %cst_16 = arith.constant dense<0.000000e+00> : vector<8x128xf32>
    %17 = tpu.matmul %14, %15, %cst_16 {dimension_numbers = #tpu.dot_dimension_numbers<[1], [0], [0], [1], [0, 0, 1, 1], [], []>} : vector<8x128xf32>, vector<128x128xf32>, vector<8x128xf32> -> vector<8x128xf32>
    %18 = vector.broadcast %16 : vector<1x128xf32> to vector<8x128xf32>
    %19 = arith.addf %17, %18 : vector<8x128xf32>
    %cst_17 = arith.constant 0.000000e+00 : f32
    %20 = vector.broadcast %cst_17 : f32 to vector<8x128xf32>
    %21 = arith.maximumf %19, %20 : vector<8x128xf32>
    %c0_18 = arith.constant 0 : index
    %c0_19 = arith.constant 0 : index
    %22 = vector.load %arg8[%c0_18, %c0_19] : memref<128x128xf32, #tpu.memory_space<vmem>>, vector<128x128xf32>
    %c0_20 = arith.constant 0 : index
    %c0_21 = arith.constant 0 : index
    %23 = vector.load %arg9[%c0_20, %c0_21] : memref<1x128xf32, #tpu.memory_space<vmem>>, vector<1x128xf32>
    %cst_22 = arith.constant dense<0.000000e+00> : vector<8x128xf32>
    %24 = tpu.matmul %21, %22, %cst_22 {dimension_numbers = #tpu.dot_dimension_numbers<[1], [0], [0], [1], [0, 0, 1, 1], [], []>} : vector<8x128xf32>, vector<128x128xf32>, vector<8x128xf32> -> vector<8x128xf32>
    %25 = vector.broadcast %23 : vector<1x128xf32> to vector<8x128xf32>
    %26 = arith.addf %24, %25 : vector<8x128xf32>
    %cst_23 = arith.constant 0.000000e+00 : f32
    %27 = vector.broadcast %cst_23 : f32 to vector<8x128xf32>
    %28 = arith.maximumf %26, %27 : vector<8x128xf32>
    %c0_24 = arith.constant 0 : index
    %c0_25 = arith.constant 0 : index
    %29 = vector.load %arg10[%c0_24, %c0_25] : memref<128x128xf32, #tpu.memory_space<vmem>>, vector<128x128xf32>
    %c0_26 = arith.constant 0 : index
    %c0_27 = arith.constant 0 : index
    %30 = vector.load %arg11[%c0_26, %c0_27] : memref<1x128xf32, #tpu.memory_space<vmem>>, vector<1x128xf32>
    %cst_28 = arith.constant dense<0.000000e+00> : vector<8x128xf32>
    %31 = tpu.matmul %28, %29, %cst_28 {dimension_numbers = #tpu.dot_dimension_numbers<[1], [0], [0], [1], [0, 0, 1, 1], [], []>} : vector<8x128xf32>, vector<128x128xf32>, vector<8x128xf32> -> vector<8x128xf32>
    %32 = vector.broadcast %30 : vector<1x128xf32> to vector<8x128xf32>
    %33 = arith.addf %31, %32 : vector<8x128xf32>
    %cst_29 = arith.constant 0.000000e+00 : f32
    %34 = vector.broadcast %cst_29 : f32 to vector<8x128xf32>
    %35 = arith.maximumf %33, %34 : vector<8x128xf32>
    %c0_30 = arith.constant 0 : index
    %c0_31 = arith.constant 0 : index
    %36 = vector.load %arg12[%c0_30, %c0_31] : memref<128x128xf32, #tpu.memory_space<vmem>>, vector<128x128xf32>
    %c0_32 = arith.constant 0 : index
    %c0_33 = arith.constant 0 : index
    %37 = vector.load %arg13[%c0_32, %c0_33] : memref<1x128xf32, #tpu.memory_space<vmem>>, vector<1x128xf32>
    %cst_34 = arith.constant dense<0.000000e+00> : vector<8x128xf32>
    %38 = tpu.matmul %35, %36, %cst_34 {dimension_numbers = #tpu.dot_dimension_numbers<[1], [0], [0], [1], [0, 0, 1, 1], [], []>} : vector<8x128xf32>, vector<128x128xf32>, vector<8x128xf32> -> vector<8x128xf32>
    %39 = vector.broadcast %37 : vector<1x128xf32> to vector<8x128xf32>
    %40 = arith.addf %38, %39 : vector<8x128xf32>
    %c0_35 = arith.constant 0 : index
    %c0_36 = arith.constant 0 : index
    %41 = vector.load %arg14[%c0_35, %c0_36] : memref<8x128xf32, #tpu.memory_space<vmem>>, vector<8x128xf32>
    tpu.vector_store %arg14[%c0_35, %c0_36], %40 {strides = array<i32>} : memref<8x128xf32, #tpu.memory_space<vmem>>, vector<8x128xf32>,
    return
  }
  func.func @transform_0(%arg0: i32) -> (i32, i32) {
    %c0_i32 = arith.constant 0 : i32
    %c0_i32_0 = arith.constant 0 : i32
    return %arg0, %c0_i32 : i32, i32
  }
  func.func @transform_1(%arg0: i32) -> (i32, i32) {
    %c0_i32 = arith.constant 0 : i32
    %c0_i32_0 = arith.constant 0 : i32
    %c0_i32_1 = arith.constant 0 : i32
    return %c0_i32, %c0_i32_0 : i32, i32
  }
  func.func @transform_2(%arg0: i32) -> (i32, i32) {
    %c0_i32 = arith.constant 0 : i32
    %c0_i32_0 = arith.constant 0 : i32
    %c0_i32_1 = arith.constant 0 : i32
    return %c0_i32, %c0_i32_0 : i32, i32
  }
  func.func @transform_3(%arg0: i32) -> (i32, i32) {
    %c0_i32 = arith.constant 0 : i32
    %c0_i32_0 = arith.constant 0 : i32
    %c0_i32_1 = arith.constant 0 : i32
    return %c0_i32, %c0_i32_0 : i32, i32
  }
  func.func @transform_4(%arg0: i32) -> (i32, i32) {
    %c0_i32 = arith.constant 0 : i32
    %c0_i32_0 = arith.constant 0 : i32
    %c0_i32_1 = arith.constant 0 : i32
    return %c0_i32, %c0_i32_0 : i32, i32
  }
  func.func @transform_5(%arg0: i32) -> (i32, i32) {
    %c0_i32 = arith.constant 0 : i32
    %c0_i32_0 = arith.constant 0 : i32
    %c0_i32_1 = arith.constant 0 : i32
    return %c0_i32, %c0_i32_0 : i32, i32
  }
  func.func @transform_6(%arg0: i32) -> (i32, i32) {
    %c0_i32 = arith.constant 0 : i32
    %c0_i32_0 = arith.constant 0 : i32
    %c0_i32_1 = arith.constant 0 : i32
    return %c0_i32, %c0_i32_0 : i32, i32
  }
  func.func @transform_7(%arg0: i32) -> (i32, i32) {
    %c0_i32 = arith.constant 0 : i32
    %c0_i32_0 = arith.constant 0 : i32
    %c0_i32_1 = arith.constant 0 : i32
    return %c0_i32, %c0_i32_0 : i32, i32
  }
  func.func @transform_8(%arg0: i32) -> (i32, i32) {
    %c0_i32 = arith.constant 0 : i32
    %c0_i32_0 = arith.constant 0 : i32
    %c0_i32_1 = arith.constant 0 : i32
    return %c0_i32, %c0_i32_0 : i32, i32
  }
  func.func @transform_9(%arg0: i32) -> (i32, i32) {
    %c0_i32 = arith.constant 0 : i32
    %c0_i32_0 = arith.constant 0 : i32
    %c0_i32_1 = arith.constant 0 : i32
    return %c0_i32, %c0_i32_0 : i32, i32
  }
  func.func @transform_10(%arg0: i32) -> (i32, i32) {
    %c0_i32 = arith.constant 0 : i32
    %c0_i32_0 = arith.constant 0 : i32
    %c0_i32_1 = arith.constant 0 : i32
    return %c0_i32, %c0_i32_0 : i32, i32
  }
  func.func @transform_11(%arg0: i32) -> (i32, i32) {
    %c0_i32 = arith.constant 0 : i32
    %c0_i32_0 = arith.constant 0 : i32
    %c0_i32_1 = arith.constant 0 : i32
    return %c0_i32, %c0_i32_0 : i32, i32
  }
  func.func @transform_12(%arg0: i32) -> (i32, i32) {
    %c0_i32 = arith.constant 0 : i32
    %c0_i32_0 = arith.constant 0 : i32
    %c0_i32_1 = arith.constant 0 : i32
    return %c0_i32, %c0_i32_0 : i32, i32
  }
  func.func @transform_13(%arg0: i32) -> (i32, i32) {
    %c0_i32 = arith.constant 0 : i32
    %c0_i32_0 = arith.constant 0 : i32
    return %arg0, %c0_i32 : i32, i32
  }
}

</mosaic_0001>

<bundles_post_ra>
// kernel: tpu_custom_call.1
= control target key start
LH: loop header
LB: loop body
LE: loop exit
PB: predicated region body
PF: predicated region fallthrough
CT: control target
= control target key end

     0   :  { %18 = vsyncpa [#allocation3], 0  ;;  %s1870_s0 = inlined_call_operand.hbm [shape: f32[8,1024], index: 0, kind: input, shape index: {}]   ;;  %s1871_s1 = inlined_call_operand.hbm [shape: f32[1024,128], index: 1, kind: input, shape index: {}]   ;;  %s1872_s2 = inlined_call_operand.vmem [shape: f32[1,128], index: 2, kind: input, shape index: {}]   ;;  %s1873_s3 = inlined_call_operand.hbm [shape: f32[128,128], index: 3, kind: input, shape index: {}]   ;;  %s1874_s4 = inlined_call_operand.vmem [shape: f32[1,128], index: 4, kind: input, shape index: {}]   ;;  %s1875_s5 = inlined_call_operand.hbm [shape: f32[128,128], index: 5, kind: input, shape index: {}]   ;;  %s1876_s6 = inlined_call_operand.vmem [shape: f32[1,128], index: 6, kind: input, shape index: {}]   ;;  %s1877_s7 = inlined_call_operand.hbm [shape: f32[128,128], index: 7, kind: input, shape index: {}]   ;;  %s1878_s8 = inlined_call_operand.vmem [shape: f32[1,128], index: 8, kind: input, shape index: {}]   ;;  %s1879_s9 = inlined_call_operand.hbm [shape: f32[128,128], index: 9, kind: input, shape index: {}]   ;;  %s1880_s10 = inlined_call_operand.vmem [shape: f32[1,128], index: 10, kind: input, shape index: {}]   ;;  %s1881_s11 = inlined_call_operand.hbm [shape: f32[128,128], index: 11, kind: input, shape index: {}]   ;;  %s1882_s12 = inlined_call_operand.vmem [shape: f32[1,128], index: 12, kind: input, shape index: {}]   ;;  %s1883_s13 = inlined_call_operand.hbm [shape: f32[8,128], index: 13, kind: output, shape index: {}]  }
   0x1   :  { %19 = vsyncpa [#allocation6], 0 }
   0x2   :  { %20 = vsyncpa [#allocation9], 0 }
   0x3   :  { %21 = vsyncpa [#allocation12], 0 }
   0x4   :  { %22 = vsyncpa [#allocation4], 0  ;;  %s1638_s25 = smov [#allocation5]  }
   0x5   :  { %s38_s26 = sshll.u32 %s1638_s25, 4  ;;  %s39_s26 = int_to_ptr.vmem [resolvable:$true] %s38_s26 }
   0x6   :  { %s1476_s27 = scalar_lea.vmem %s39_s26, 16384  ;;  %p1481_p1 = scmp.lt.s32.totalorder %s39_s26, %s39_s26 }
   0x7   :  { %p1477_p0 = scmp.ne.s32.totalorder %s39_s26, %s1476_s27  ;;  %p1482_p2 = scmp.lt.s32.totalorder %s1476_s27, %s1476_s27 }
   0x9   :  { %p1483_p3 = por %p1482_p2, %p1481_p1 }
   0xb   :  { %p1484_p4 = pnand %p1483_p3, %p1477_p0 }
   0xd   :  { %1487 = shalt.err (!%p1484_p4)
}
   0xe   :  { %s1639_s28 = smov 128   ;;  %s1640_s29 = smov 8  }
   0xf   :  { %44 = dma.hbm_to_vmem [thread:$0]  %s1871_s1, 16384, %s39_s26, [#allocation6], %s1639_s28, %s1639_s28, %s1640_s29  }
  0x10   :  { %s1641_s15 = smov [#allocation8]   ;;  %s1642_s17 = smov [#allocation11]  }
  0x11   :  { %s66_s16 = sshll.u32 %s1641_s15, 4  ;;  %s94_s18 = sshll.u32 %s1642_s17, 4  ;;  %s67_s16 = int_to_ptr.vmem [resolvable:$true] %s66_s16  ;;  %s95_s18 = int_to_ptr.vmem [resolvable:$true] %s94_s18 }
  0x12   :  { %s1496_s19 = scalar_lea.vmem %s67_s16, 2048  ;;  %p1501_p6 = scmp.lt.s32.totalorder %s67_s16, %s67_s16 }
  0x13   :  { %p1497_p5 = scmp.ne.s32.totalorder %s67_s16, %s1496_s19  ;;  %p1502_p7 = scmp.lt.s32.totalorder %s1496_s19, %s1496_s19 }
  0x15   :  { %p1503_p8 = por %p1502_p7, %p1501_p6 }
  0x17   :  { %p1504_p9 = pnand %p1503_p8, %p1497_p5 }
  0x19   :  { %1507 = shalt.err (!%p1504_p9)
}
  0x1a   :  { %72 = dma.hbm_to_vmem [thread:$0]  %s1875_s5, 2048, %s67_s16, [#allocation9], %s1639_s28, %s1639_s28, %s1640_s29  }
  0x1b   :  { %s1516_s1 = scalar_lea.vmem %s95_s18, 2048  ;;  %p1521_p11 = scmp.lt.s32.totalorder %s95_s18, %s95_s18 }
  0x1c   :  { %p1517_p10 = scmp.ne.s32.totalorder %s95_s18, %s1516_s1  ;;  %p1522_p12 = scmp.lt.s32.totalorder %s1516_s1, %s1516_s1 }
  0x1e   :  { %p1523_p13 = por %p1522_p12, %p1521_p11 }
  0x20   :  { %p1524_p0 = pnand %p1523_p13, %p1517_p10 }
  0x22   :  { %1527 = shalt.err (!%p1524_p0)
}
  0x23   :  { %100 = dma.hbm_to_vmem [thread:$0]  %s1879_s9, 2048, %s95_s18, [#allocation12], %s1639_s28, %s1639_s28, %s1640_s29  }
  0x24   :  { %s1643_s24 = smov [#allocation2]   ;;  %s1644_s26 = smov [#allocation7]  }
  0x25   :  { %s29_s25 = sshll.u32 %s1643_s24, 4  ;;  %s52_s5 = sshll.u32 %s1644_s26, 4  ;;  %s30_s25 = int_to_ptr.vmem [resolvable:$true] %s29_s25  ;;  %s53_s5 = int_to_ptr.vmem [resolvable:$true] %s52_s5 }
  0x26   :  { %s1536_s27 = scalar_lea.vmem %s30_s25, 1024  ;;  %p1541_p2 = scmp.lt.s32.totalorder %s30_s25, %s30_s25 }
  0x27   :  { %p1537_p1 = scmp.ne.s32.totalorder %s30_s25, %s1536_s27  ;;  %p1542_p3 = scmp.lt.s32.totalorder %s1536_s27, %s1536_s27 }
  0x29   :  { %p1543_p4 = por %p1542_p3, %p1541_p2 }
  0x2b   :  { %p1544_p5 = pnand %p1543_p4, %p1537_p1 }
  0x2d   :  { %1547 = shalt.err (!%p1544_p5)
}
  0x2e   :  { %32 = dma.hbm_to_vmem [thread:$0]  %s1870_s0, 1024, %s30_s25, [#allocation3]  }
  0x2f   :  { %s1556_s15 = scalar_lea.vmem %s53_s5, 2048  ;;  %p1561_p7 = scmp.lt.s32.totalorder %s53_s5, %s53_s5 }
  0x30   :  { %p1557_p6 = scmp.ne.s32.totalorder %s53_s5, %s1556_s15  ;;  %p1562_p8 = scmp.lt.s32.totalorder %s1556_s15, %s1556_s15 }
  0x32   :  { %p1563_p9 = por %p1562_p8, %p1561_p7 }
  0x34   :  { %p1564_p10 = pnand %p1563_p9, %p1557_p6 }
  0x36   :  { %1567 = shalt.err (!%p1564_p10)
}
  0x37   :  { %58 = dma.hbm_to_vmem [thread:$0]  %s1873_s3, 2048, %s53_s5, [#allocation6], %s1639_s28, %s1639_s28, %s1640_s29  }
  0x38   :  { %s1645_s17 = smov [#allocation10]   ;;  %s1646_s19 = smov [#allocation13]  }
  0x39   :  { %s80_s18 = sshll.u32 %s1645_s17, 4  ;;  %s108_s0 = sshll.u32 %s1646_s19, 4  ;;  %s81_s18 = int_to_ptr.vmem [resolvable:$true] %s80_s18  ;;  %s109_s0 = int_to_ptr.vmem [resolvable:$true] %s108_s0 }
  0x3a   :  { %s1576_s20 = scalar_lea.vmem %s81_s18, 2048  ;;  %p1581_p12 = scmp.lt.s32.totalorder %s81_s18, %s81_s18 }
  0x3b   :  { %p1577_p11 = scmp.ne.s32.totalorder %s81_s18, %s1576_s20  ;;  %p1582_p13 = scmp.lt.s32.totalorder %s1576_s20, %s1576_s20 }
  0x3d   :  { %p1583_p0 = por %p1582_p13, %p1581_p12 }
  0x3f   :  { %p1584_p1 = pnand %p1583_p0, %p1577_p11 }
  0x41   :  { %1587 = shalt.err (!%p1584_p1)
}
  0x42   :  { %86 = dma.hbm_to_vmem [thread:$0]  %s1877_s7, 2048, %s81_s18, [#allocation9], %s1639_s28, %s1639_s28, %s1640_s29  }
  0x43   :  { %s1596_s3 = scalar_lea.vmem %s109_s0, 2048  ;;  %p1601_p3 = scmp.lt.s32.totalorder %s109_s0, %s109_s0 }
  0x44   :  { %p1597_p2 = scmp.ne.s32.totalorder %s109_s0, %s1596_s3  ;;  %p1602_p4 = scmp.lt.s32.totalorder %s1596_s3, %s1596_s3 }
  0x46   :  { %p1603_p5 = por %p1602_p4, %p1601_p3 }
  0x48   :  { %p1604_p6 = pnand %p1603_p5, %p1597_p2 }
  0x4a   :  { %1607 = shalt.err (!%p1604_p6)
}
  0x4b   :  { %114 = dma.hbm_to_vmem [thread:$0]  %s1881_s11, 2048, %s109_s0, [#allocation12], %s1639_s28, %s1639_s28, %s1640_s29  }
  0x4c   :  { %1628 = dma.done.wait [#allocation3], 1024  }
  0x4d   :  { %1629 = vsyncadd [#allocation3], 4294966272 }
  0x4e   :  { %1630 = dma.done.wait [#allocation6], 18432  }
  0x4f   :  { %1631 = vsyncadd [#allocation6], 4294948864 }
  0x50   :  { %1632 = dma.done.wait [#allocation9], 4096  }
  0x51   :  { %1633 = vsyncadd [#allocation9], 4294963200 }
  0x52   :  { %1634 = dma.done.wait [#allocation12], 4096  }
  0x53   :  { %1635 = vsyncadd [#allocation12], 4294963200  ;;  %v177_v0 = vld [vmem:[#allocation5 + $0xf8] sm:$0xff]  ;;  %v176_v4 = vld [vmem:[#allocation5 + $0xf0] sm:$0xff]  ;;  %vm1648_vm0 = vmmov 0   ;;  %s1649_s27 = smov [#allocation14]  }
  0x54   :  { %v209_v1 = vld [vmem:[#allocation5 + $0x1f8] sm:$0xff]  ;;  %1056 = vmatprep.subr.mxu0 %v177_v0  ;;  %v208_v5 = vld [vmem:[#allocation5 + $0x1f0] sm:$0xff]  ;;  %v175_v8 = vld [vmem:[#allocation5 + $0xe8] sm:$0xff]  ;;  %s1038_s30 = sshll.u32 %s1649_s27, 4  ;;  %s1039_s30 = int_to_ptr.vmem [resolvable:$true] %s1038_s30 }
  0x55   :  { %v161_v2 = vld [vmem:[#allocation5 + $0x78] sm:$0xff]  ;;  %1091 = vmatprep.subr.mxu1 %v209_v1  ;;  %v160_v6 = vld [vmem:[#allocation5 + $0x70] sm:$0xff]  ;;  %v207_v9 = vld [vmem:[#allocation5 + $0x1e8] sm:$0xff]  ;;  %s1608_s14 = scalar_lea.vmem %s1039_s30, 128  ;;  %p1613_p8 = scmp.lt.s32.totalorder %s1039_s30, %s1039_s30 }
  0x56   :  { %v193_v3 = vld [vmem:[#allocation5 + $0x178] sm:$0xff]  ;;  %1057 = vmatpush3.msra.mxu0 %v161_v2  ;;  %v192_v7 = vld [vmem:[#allocation5 + $0x170] sm:$0xff]  ;;  %v159_v10 = vld [vmem:[#allocation5 + $0x68] sm:$0xff]  ;;  %p1609_p7 = scmp.ne.s32.totalorder %s1039_s30, %s1608_s14  ;;  %p1614_p9 = scmp.lt.s32.totalorder %s1608_s14, %s1608_s14 }
  0x57   :  { %1092 = vmatpush3.msra.mxu1 %v193_v3  ;;  %1058 = vmatprep.subr.mxu0 %v176_v4  ;;  %v191_v11 = vld [vmem:[#allocation5 + $0x168] sm:$0xff]  ;;  %v174_v12 = vld [vmem:[#allocation5 + $0xe0] sm:$0xff]  ;;  %v173_v16 = vld [vmem:[#allocation5 + $0xd8] sm:$0xff] }
  0x58   :  { %1093 = vmatprep.subr.mxu1 %v208_v5  ;;  %1059 = vmatpush3.msra.mxu0 %v160_v6  ;;  %v206_v13 = vld [vmem:[#allocation5 + $0x1e0] sm:$0xff]  ;;  %v205_v17 = vld [vmem:[#allocation5 + $0x1d8] sm:$0xff]  ;;  %v172_v20 = vld [vmem:[#allocation5 + $0xd0] sm:$0xff]  ;;  %p1615_p10 = por %p1614_p9, %p1613_p8 }
  0x59   :  { %1094 = vmatpush3.msra.mxu1 %v192_v7  ;;  %1060 = vmatprep.subr.mxu0 %v175_v8  ;;  %v158_v14 = vld [vmem:[#allocation5 + $0x60] sm:$0xff]  ;;  %v157_v18 = vld [vmem:[#allocation5 + $0x58] sm:$0xff]  ;;  %v204_v21 = vld [vmem:[#allocation5 + $0x1d0] sm:$0xff] }
  0x5a   :  { %1095 = vmatprep.subr.mxu1 %v207_v9  ;;  %v190_v15 = vld [vmem:[#allocation5 + $0x160] sm:$0xff]  ;;  %1061 = vmatpush3.msra.mxu0 %v159_v10  ;;  %v189_v19 = vld [vmem:[#allocation5 + $0x158] sm:$0xff]  ;;  %v156_v22 = vld [vmem:[#allocation5 + $0x50] sm:$0xff]  ;;  %p1616_p11 = pnand %p1615_p10, %p1609_p7 }
  0x5b   :  { %1096 = vmatpush3.msra.mxu1 %v191_v11  ;;  %1062 = vmatprep.subr.mxu0 %v174_v12  ;;  %v188_v23 = vld [vmem:[#allocation5 + $0x150] sm:$0xff]  ;;  %v171_v24 = vld [vmem:[#allocation5 + $0xc8] sm:$0xff]  ;;  %v170_v28 = vld [vmem:[#allocation5 + $0xc0] sm:$0xff] }
  0x5c   :  { %1097 = vmatprep.subr.mxu1 %v206_v13  ;;  %1063 = vmatpush3.msra.mxu0 %v158_v14  ;;  %v203_v25 = vld [vmem:[#allocation5 + $0x1c8] sm:$0xff]  ;;  %v202_v29 = vld [vmem:[#allocation5 + $0x1c0] sm:$0xff]  ;;  %v169_v32 = vld [vmem:[#allocation5 + $0xb8] sm:$0xff] }
  0x5d   :  { %1098 = vmatpush3.msra.mxu1 %v190_v15  ;;  %1064 = vmatprep.subr.mxu0 %v173_v16  ;;  %v155_v26 = vld [vmem:[#allocation5 + $0x48] sm:$0xff]  ;;  %v154_v30 = vld [vmem:[#allocation5 + $0x40] sm:$0xff]  ;;  %v201_v33 = vld [vmem:[#allocation5 + $0x1b8] sm:$0xff] }
  0x5e   :  { %1099 = vmatprep.subr.mxu1 %v205_v17  ;;  %1065 = vmatpush3.msra.mxu0 %v157_v18  ;;  %v187_v27 = vld [vmem:[#allocation5 + $0x148] sm:$0xff]  ;;  %v186_v31 = vld [vmem:[#allocation5 + $0x140] sm:$0xff]  ;;  %v153_v34 = vld [vmem:[#allocation5 + $0x38] sm:$0xff] }
  0x5f   :  { %1100 = vmatpush3.msra.mxu1 %v189_v19  ;;  %1066 = vmatprep.subr.mxu0 %v172_v20  ;;  %v185_v35 = vld [vmem:[#allocation5 + $0x138] sm:$0xff]  ;;  %v168_v36 = vld [vmem:[#allocation5 + $0xb0] sm:$0xff]  ;;  %v167_v40 = vld [vmem:[#allocation5 + $0xa8] sm:$0xff] }
  0x60   :  { %1101 = vmatprep.subr.mxu1 %v204_v21  ;;  %1067 = vmatpush3.msra.mxu0 %v156_v22  ;;  %v200_v37 = vld [vmem:[#allocation5 + $0x1b0] sm:$0xff]  ;;  %v199_v41 = vld [vmem:[#allocation5 + $0x1a8] sm:$0xff]  ;;  %v166_v44 = vld [vmem:[#allocation5 + $0xa0] sm:$0xff] }
  0x61   :  { %1102 = vmatpush3.msra.mxu1 %v188_v23  ;;  %1068 = vmatprep.subr.mxu0 %v171_v24  ;;  %v152_v38 = vld [vmem:[#allocation5 + $0x30] sm:$0xff]  ;;  %v151_v42 = vld [vmem:[#allocation5 + $0x28] sm:$0xff]  ;;  %v198_v45 = vld [vmem:[#allocation5 + $0x1a0] sm:$0xff] }
  0x62   :  { %1103 = vmatprep.subr.mxu1 %v203_v25  ;;  %1069 = vmatpush3.msra.mxu0 %v155_v26  ;;  %v184_v39 = vld [vmem:[#allocation5 + $0x130] sm:$0xff]  ;;  %v183_v43 = vld [vmem:[#allocation5 + $0x128] sm:$0xff]  ;;  %v150_v46 = vld [vmem:[#allocation5 + $0x20] sm:$0xff] }
  0x63   :  { %1104 = vmatpush3.msra.mxu1 %v187_v27  ;;  %1070 = vmatprep.subr.mxu0 %v170_v28  ;;  %v182_v47 = vld [vmem:[#allocation5 + $0x120] sm:$0xff]  ;;  %v165_v48 = vld [vmem:[#allocation5 + $0x98] sm:$0xff]  ;;  %v164_v52 = vld [vmem:[#allocation5 + $0x90] sm:$0xff] }
  0x64   :  { %1105 = vmatprep.subr.mxu1 %v202_v29  ;;  %1071 = vmatpush3.msra.mxu0 %v154_v30  ;;  %v197_v49 = vld [vmem:[#allocation5 + $0x198] sm:$0xff]  ;;  %v196_v53 = vld [vmem:[#allocation5 + $0x190] sm:$0xff]  ;;  %v163_v56 = vld [vmem:[#allocation5 + $0x88] sm:$0xff] }
  0x65   :  { %1106 = vmatpush3.msra.mxu1 %v186_v31  ;;  %1072 = vmatprep.subr.mxu0 %v169_v32  ;;  %v149_v50 = vld [vmem:[#allocation5 + $0x18] sm:$0xff]  ;;  %v148_v54 = vld [vmem:[#allocation5 + $0x10] sm:$0xff]  ;;  %v195_v57 = vld [vmem:[#allocation5 + $0x188] sm:$0xff] }
  0x66   :  { %1107 = vmatprep.subr.mxu1 %v201_v33  ;;  %1073 = vmatpush3.msra.mxu0 %v153_v34  ;;  %v181_v51 = vld [vmem:[#allocation5 + $0x118] sm:$0xff]  ;;  %v180_v55 = vld [vmem:[#allocation5 + $0x110] sm:$0xff]  ;;  %v147_v58 = vld [vmem:[#allocation5 + $0x8] sm:$0xff] }
  0x67   :  { %1108 = vmatpush3.msra.mxu1 %v185_v35  ;;  %1074 = vmatprep.subr.mxu0 %v168_v36  ;;  %v179_v59 = vld [vmem:[#allocation5 + $0x108] sm:$0xff]  ;;  %v162_v60 = vld [vmem:[#allocation5 + $0x80] sm:$0xff]  ;;  %v141_v2 = vld [vmem:[#allocation2 + $0x18] sm:$0xff] }
  0x68   :  { %1109 = vmatprep.subr.mxu1 %v200_v37  ;;  %1075 = vmatpush3.msra.mxu0 %v152_v38  ;;  %v194_v61 = vld [vmem:[#allocation5 + $0x180] sm:$0xff]  ;;  %v139_v63 = vld [vmem:[#allocation2 + $0x8] sm:$0xff]  ;;  %v241_v3 = vld [vmem:[#allocation5 + $0x2f8] sm:$0xff] }
  0x69   :  { %1110 = vmatpush3.msra.mxu1 %v184_v39  ;;  %1076 = vmatprep.subr.mxu0 %v167_v40  ;;  %v146_v62 = vld [vmem:[#allocation5] sm:$0xff]  ;;  %v273_v4 = vld [vmem:[#allocation5 + $0x3f8] sm:$0xff]  ;;  %v140_v5 = vld [vmem:[#allocation2 + $0x10] sm:$0xff] }
  0x6a   :  { %1111 = vmatprep.subr.mxu1 %v199_v41  ;;  %1077 = vmatpush3.msra.mxu0 %v151_v42  ;;  %v178_v0 = vld [vmem:[#allocation5 + $0x100] sm:$0xff]  ;;  %v225_v6 = vld [vmem:[#allocation5 + $0x278] sm:$0xff]  ;;  %v240_v8 = vld [vmem:[#allocation5 + $0x2f0] sm:$0xff] }
  0x6b   :  { %1112 = vmatpush3.msra.mxu1 %v183_v43  ;;  %1078 = vmatprep.subr.mxu0 %v166_v44  ;;  %v138_v1 = vld [vmem:[#allocation2] sm:$0xff]  ;;  %v257_v7 = vld [vmem:[#allocation5 + $0x378] sm:$0xff]  ;;  %v272_v9 = vld [vmem:[#allocation5 + $0x3f0] sm:$0xff] }
  0x6c   :  { %1113 = vmatprep.subr.mxu1 %v198_v45  ;;  %1079 = vmatpush3.msra.mxu0 %v150_v46  ;;  %v224_v10 = vld [vmem:[#allocation5 + $0x270] sm:$0xff]  ;;  %v239_v12 = vld [vmem:[#allocation5 + $0x2e8] sm:$0xff]  ;;  %v238_v16 = vld [vmem:[#allocation5 + $0x2e0] sm:$0xff] }
  0x6d   :  { %1114 = vmatpush3.msra.mxu1 %v182_v47  ;;  %1080 = vmatprep.subr.mxu0 %v165_v48  ;;  %v256_v11 = vld [vmem:[#allocation5 + $0x370] sm:$0xff]  ;;  %v271_v13 = vld [vmem:[#allocation5 + $0x3e8] sm:$0xff]  ;;  %v270_v17 = vld [vmem:[#allocation5 + $0x3e0] sm:$0xff] }
  0x6e   :  { %1115 = vmatprep.subr.mxu1 %v197_v49  ;;  %1081 = vmatpush3.msra.mxu0 %v149_v50  ;;  %v223_v14 = vld [vmem:[#allocation5 + $0x268] sm:$0xff]  ;;  %v222_v18 = vld [vmem:[#allocation5 + $0x260] sm:$0xff]  ;;  %v237_v20 = vld [vmem:[#allocation5 + $0x2d8] sm:$0xff] }
  0x6f   :  { %1116 = vmatpush3.msra.mxu1 %v181_v51  ;;  %1082 = vmatprep.subr.mxu0 %v164_v52  ;;  %v255_v15 = vld [vmem:[#allocation5 + $0x368] sm:$0xff]  ;;  %v254_v19 = vld [vmem:[#allocation5 + $0x360] sm:$0xff]  ;;  %v269_v21 = vld [vmem:[#allocation5 + $0x3d8] sm:$0xff] }
  0x70   :  { %1117 = vmatprep.subr.mxu1 %v196_v53  ;;  %1083 = vmatpush3.msra.mxu0 %v148_v54  ;;  %v221_v22 = vld [vmem:[#allocation5 + $0x258] sm:$0xff]  ;;  %v236_v24 = vld [vmem:[#allocation5 + $0x2d0] sm:$0xff]  ;;  %v235_v28 = vld [vmem:[#allocation5 + $0x2c8] sm:$0xff] }
  0x71   :  { %1118 = vmatpush3.msra.mxu1 %v180_v55  ;;  %1084 = vmatprep.subr.mxu0 %v163_v56  ;;  %v253_v23 = vld [vmem:[#allocation5 + $0x358] sm:$0xff]  ;;  %v268_v25 = vld [vmem:[#allocation5 + $0x3d0] sm:$0xff]  ;;  %v267_v29 = vld [vmem:[#allocation5 + $0x3c8] sm:$0xff] }
  0x72   :  { %1119 = vmatprep.subr.mxu1 %v195_v57  ;;  %1085 = vmatpush3.msra.mxu0 %v147_v58  ;;  %v220_v26 = vld [vmem:[#allocation5 + $0x250] sm:$0xff]  ;;  %v219_v30 = vld [vmem:[#allocation5 + $0x248] sm:$0xff]  ;;  %v234_v32 = vld [vmem:[#allocation5 + $0x2c0] sm:$0xff] }
  0x73   :  { %1120 = vmatpush3.msra.mxu1 %v179_v59  ;;  %1086 = vmatprep.subr.mxu0 %v162_v60  ;;  %v252_v27 = vld [vmem:[#allocation5 + $0x350] sm:$0xff]  ;;  %v251_v31 = vld [vmem:[#allocation5 + $0x348] sm:$0xff]  ;;  %v266_v33 = vld [vmem:[#allocation5 + $0x3c0] sm:$0xff] }
  0x74   :  { %1121 = vmatprep.subr.mxu1 %v194_v61  ;;  %1087 = vmatpush3.msra.mxu0 %v146_v62  ;;  %v218_v34 = vld [vmem:[#allocation5 + $0x240] sm:$0xff]  ;;  %v233_v36 = vld [vmem:[#allocation5 + $0x2b8] sm:$0xff]  ;;  %v232_v40 = vld [vmem:[#allocation5 + $0x2b0] sm:$0xff] }
  0x75   :  { %345 = vmatprep.mubr.f32.mxu0 %v139_v63  ;;  %1122 = vmatpush3.msra.mxu1 %v178_v0  ;;  %v250_v35 = vld [vmem:[#allocation5 + $0x340] sm:$0xff]  ;;  %v265_v37 = vld [vmem:[#allocation5 + $0x3b8] sm:$0xff]  ;;  %v264_v41 = vld [vmem:[#allocation5 + $0x3b0] sm:$0xff] }
  0x76   :  { %346 = vmatmul.mubr.f32.vlgmr.msra.gmra.mxu0 %v138_v1  ;;  %415 = vmatprep.mubr.f32.mxu1 %v141_v2  ;;  %v217_v38 = vld [vmem:[#allocation5 + $0x238] sm:$0xff]  ;;  %v216_v42 = vld [vmem:[#allocation5 + $0x230] sm:$0xff]  ;;  %v231_v44 = vld [vmem:[#allocation5 + $0x2a8] sm:$0xff] }
  0x77   :  { %1126 = vmatprep.subr.mxu0 %v241_v3  ;;  %1161 = vmatprep.subr.mxu1 %v273_v4  ;;  %v249_v39 = vld [vmem:[#allocation5 + $0x338] sm:$0xff]  ;;  %v248_v43 = vld [vmem:[#allocation5 + $0x330] sm:$0xff]  ;;  %v263_v45 = vld [vmem:[#allocation5 + $0x3a8] sm:$0xff] }
  0x78   :  { %416 = vmatmul.mubr.f32.vlgmr.msra.gmra.mxu1 %v140_v5  ;;  %1127 = vmatpush3.msra.mxu0 %v225_v6  ;;  %v215_v46 = vld [vmem:[#allocation5 + $0x228] sm:$0xff]  ;;  %v230_v48 = vld [vmem:[#allocation5 + $0x2a0] sm:$0xff]  ;;  %v229_v52 = vld [vmem:[#allocation5 + $0x298] sm:$0xff] }
  0x79   :  { %1162 = vmatpush3.msra.mxu1 %v257_v7  ;;  %1128 = vmatprep.subr.mxu0 %v240_v8  ;;  %v247_v47 = vld [vmem:[#allocation5 + $0x328] sm:$0xff]  ;;  %v262_v49 = vld [vmem:[#allocation5 + $0x3a0] sm:$0xff]  ;;  %v261_v53 = vld [vmem:[#allocation5 + $0x398] sm:$0xff] }
  0x7a   :  { %1163 = vmatprep.subr.mxu1 %v272_v9  ;;  %1129 = vmatpush3.msra.mxu0 %v224_v10  ;;  %v214_v50 = vld [vmem:[#allocation5 + $0x220] sm:$0xff]  ;;  %v213_v54 = vld [vmem:[#allocation5 + $0x218] sm:$0xff]  ;;  %v228_v56 = vld [vmem:[#allocation5 + $0x290] sm:$0xff]  ;;  %v1647_v9 = vmov 0.0  }
  0x7b   :  { %1164 = vmatpush3.msra.mxu1 %v256_v11  ;;  %1130 = vmatprep.subr.mxu0 %v239_v12  ;;  %v246_v51 = vld [vmem:[#allocation5 + $0x320] sm:$0xff]  ;;  %v245_v55 = vld [vmem:[#allocation5 + $0x318] sm:$0xff]  ;;  %v260_v57 = vld [vmem:[#allocation5 + $0x390] sm:$0xff] }
  0x7c   :  { %1165 = vmatprep.subr.mxu1 %v271_v13  ;;  %1131 = vmatpush3.msra.mxu0 %v223_v14  ;;  %v212_v58 = vld [vmem:[#allocation5 + $0x210] sm:$0xff]  ;;  %v227_v60 = vld [vmem:[#allocation5 + $0x288] sm:$0xff]  ;;  %v226_v0 = vld [vmem:[#allocation5 + $0x280] sm:$0xff] }
  0x7d   :  { %1166 = vmatpush3.msra.mxu1 %v255_v15  ;;  %1132 = vmatprep.subr.mxu0 %v238_v16  ;;  %v244_v59 = vld [vmem:[#allocation5 + $0x310] sm:$0xff]  ;;  %v259_v61 = vld [vmem:[#allocation5 + $0x388] sm:$0xff]  ;;  %v258_v1 = vld [vmem:[#allocation5 + $0x380] sm:$0xff] }
  0x7e   :  { %1167 = vmatprep.subr.mxu1 %v270_v17  ;;  %1133 = vmatpush3.msra.mxu0 %v222_v18  ;;  %v211_v62 = vld [vmem:[#allocation5 + $0x208] sm:$0xff]  ;;  %v210_v2 = vld [vmem:[#allocation5 + $0x200] sm:$0xff]  ;;  %v145_v5 = vld [vmem:[#allocation2 + $0x38] sm:$0xff] }
  0x7f   :  { %1168 = vmatpush3.msra.mxu1 %v254_v19  ;;  %1134 = vmatprep.subr.mxu0 %v237_v20  ;;  %v243_v63 = vld [vmem:[#allocation5 + $0x308] sm:$0xff]  ;;  %v242_v4 = vld [vmem:[#allocation5 + $0x300] sm:$0xff]  ;;  %v144_v7 = vld [vmem:[#allocation2 + $0x30] sm:$0xff] }
  0x80   :  { %1169 = vmatprep.subr.mxu1 %v269_v21  ;;  %1135 = vmatpush3.msra.mxu0 %v221_v22  ;;  %v143_v3 = vld [vmem:[#allocation2 + $0x28] sm:$0xff]  ;;  %v142_v6 = vld [vmem:[#allocation2 + $0x20] sm:$0xff]  ;;  %v577_v8 = vld [vmem:[#allocation7 + $0x78] sm:$0xff] }
  0x81   :  { %1170 = vmatpush3.msra.mxu1 %v253_v23  ;;  %1136 = vmatprep.subr.mxu0 %v236_v24  ;;  %v576_v10 = vld [vmem:[#allocation7 + $0x70] sm:$0xff]  ;;  %v575_v11 = vld [vmem:[#allocation7 + $0x68] sm:$0xff]  ;;  %v574_v12 = vld [vmem:[#allocation7 + $0x60] sm:$0xff] }
  0x82   :  { %1171 = vmatprep.subr.mxu1 %v268_v25  ;;  %1137 = vmatpush3.msra.mxu0 %v220_v26  ;;  %v573_v13 = vld [vmem:[#allocation7 + $0x58] sm:$0xff]  ;;  %v572_v14 = vld [vmem:[#allocation7 + $0x50] sm:$0xff]  ;;  %v571_v15 = vld [vmem:[#allocation7 + $0x48] sm:$0xff] }
  0x83   :  { %1172 = vmatpush3.msra.mxu1 %v252_v27  ;;  %1138 = vmatprep.subr.mxu0 %v235_v28  ;;  %v570_v16 = vld [vmem:[#allocation7 + $0x40] sm:$0xff]  ;;  %v569_v17 = vld [vmem:[#allocation7 + $0x38] sm:$0xff]  ;;  %v568_v18 = vld [vmem:[#allocation7 + $0x30] sm:$0xff] }
  0x84   :  { %1173 = vmatprep.subr.mxu1 %v267_v29  ;;  %1139 = vmatpush3.msra.mxu0 %v219_v30  ;;  %v567_v19 = vld [vmem:[#allocation7 + $0x28] sm:$0xff]  ;;  %v566_v20 = vld [vmem:[#allocation7 + $0x20] sm:$0xff]  ;;  %v565_v21 = vld [vmem:[#allocation7 + $0x18] sm:$0xff] }
  0x85   :  { %1174 = vmatpush3.msra.mxu1 %v251_v31  ;;  %1140 = vmatprep.subr.mxu0 %v234_v32  ;;  %v564_v22 = vld [vmem:[#allocation7 + $0x10] sm:$0xff]  ;;  %v563_v23 = vld [vmem:[#allocation7 + $0x8] sm:$0xff]  ;;  %v562_v24 = vld [vmem:[#allocation7] sm:$0xff] }
  0x86   :  { %1175 = vmatprep.subr.mxu1 %v266_v33  ;;  %1141 = vmatpush3.msra.mxu0 %v218_v34  ;;  %v671_v25 = vld [vmem:[#allocation8 + $0x78] sm:$0xff]  ;;  %v670_v26 = vld [vmem:[#allocation8 + $0x70] sm:$0xff]  ;;  %v669_v27 = vld [vmem:[#allocation8 + $0x68] sm:$0xff] }
  0x87   :  { %1176 = vmatpush3.msra.mxu1 %v250_v35  ;;  %1142 = vmatprep.subr.mxu0 %v233_v36  ;;  %v668_v28 = vld [vmem:[#allocation8 + $0x60] sm:$0xff]  ;;  %v667_v29 = vld [vmem:[#allocation8 + $0x58] sm:$0xff]  ;;  %v666_v30 = vld [vmem:[#allocation8 + $0x50] sm:$0xff] }
  0x88   :  { %1177 = vmatprep.subr.mxu1 %v265_v37  ;;  %1143 = vmatpush3.msra.mxu0 %v217_v38  ;;  %v665_v31 = vld [vmem:[#allocation8 + $0x48] sm:$0xff]  ;;  %v664_v32 = vld [vmem:[#allocation8 + $0x40] sm:$0xff]  ;;  %v663_v33 = vld [vmem:[#allocation8 + $0x38] sm:$0xff] }
  0x89   :  { %1178 = vmatpush3.msra.mxu1 %v249_v39  ;;  %1144 = vmatprep.subr.mxu0 %v232_v40  ;;  %v662_v34 = vld [vmem:[#allocation8 + $0x30] sm:$0xff]  ;;  %v661_v35 = vld [vmem:[#allocation8 + $0x28] sm:$0xff]  ;;  %v660_v36 = vld [vmem:[#allocation8 + $0x20] sm:$0xff] }
  0x8a   :  { %1179 = vmatprep.subr.mxu1 %v264_v41  ;;  %1145 = vmatpush3.msra.mxu0 %v216_v42  ;;  %v659_v37 = vld [vmem:[#allocation8 + $0x18] sm:$0xff]  ;;  %v1050_v42 = vld [vmem:[%s1872_s2] ss:$0 sm:$0xff] }
  0x8b   :  { %1180 = vmatpush3.msra.mxu1 %v248_v43  ;;  %1146 = vmatprep.subr.mxu0 %v231_v44 }
  0x8c   :  { %1181 = vmatprep.subr.mxu1 %v263_v45  ;;  %1147 = vmatpush3.msra.mxu0 %v215_v46 }
  0x8d   :  { %1182 = vmatpush3.msra.mxu1 %v247_v47  ;;  %1148 = vmatprep.subr.mxu0 %v230_v48 }
  0x8e   :  { %1183 = vmatprep.subr.mxu1 %v262_v49  ;;  %1149 = vmatpush3.msra.mxu0 %v214_v50 }
  0x8f   :  { %1184 = vmatpush3.msra.mxu1 %v246_v51  ;;  %1150 = vmatprep.subr.mxu0 %v229_v52 }
  0x90   :  { %1185 = vmatprep.subr.mxu1 %v261_v53  ;;  %1151 = vmatpush3.msra.mxu0 %v213_v54 }
  0x91   :  { %1186 = vmatpush3.msra.mxu1 %v245_v55  ;;  %1152 = vmatprep.subr.mxu0 %v228_v56  ;;  %v658_v56 = vld [vmem:[#allocation8 + $0x10] sm:$0xff] }
  0x92   :  { %1187 = vmatprep.subr.mxu1 %v260_v57  ;;  %1153 = vmatpush3.msra.mxu0 %v212_v58  ;;  %v657_v57 = vld [vmem:[#allocation8 + $0x8] sm:$0xff]  ;;  %v656_v58 = vld [vmem:[#allocation8] sm:$0xff] }
  0x93   :  { %1188 = vmatpush3.msra.mxu1 %v244_v59  ;;  %1154 = vmatprep.subr.mxu0 %v227_v60  ;;  %v765_v59 = vld [vmem:[#allocation10 + $0x78] sm:$0xff]  ;;  %v764_v60 = vld [vmem:[#allocation10 + $0x70] sm:$0xff] }
  0x94   :  { %1189 = vmatprep.subr.mxu1 %v259_v61  ;;  %1155 = vmatpush3.msra.mxu0 %v211_v62  ;;  %v763_v61 = vld [vmem:[#allocation10 + $0x68] sm:$0xff]  ;;  %v762_v62 = vld [vmem:[#allocation10 + $0x60] sm:$0xff] }
  0x95   :  { %1190 = vmatpush3.msra.mxu1 %v243_v63  ;;  %1156 = vmatprep.subr.mxu0 %v226_v0  ;;  %v761_v63 = vld [vmem:[#allocation10 + $0x58] sm:$0xff]  ;;  %v760_v0 = vld [vmem:[#allocation10 + $0x50] sm:$0xff] }
  0x96   :  { %1191 = vmatprep.subr.mxu1 %v258_v1  ;;  %1157 = vmatpush3.msra.mxu0 %v210_v2  ;;  %v759_v1 = vld [vmem:[#allocation10 + $0x48] sm:$0xff]  ;;  %v758_v2 = vld [vmem:[#allocation10 + $0x40] sm:$0xff] }
  0x97   :  { %485 = vmatprep.mubr.f32.mxu0 %v143_v3  ;;  %1192 = vmatpush3.msra.mxu1 %v242_v4  ;;  %v757_v3 = vld [vmem:[#allocation10 + $0x38] sm:$0xff]  ;;  %v756_v4 = vld [vmem:[#allocation10 + $0x30] sm:$0xff] }
  0x98   :  { %555 = vmatprep.mubr.f32.mxu1 %v145_v5  ;;  %486 = vmatmul.mubr.f32.vlgmr.msra.gmra.mxu0 %v142_v6  ;;  %v755_v5 = vld [vmem:[#allocation10 + $0x28] sm:$0xff]  ;;  %v754_v6 = vld [vmem:[#allocation10 + $0x20] sm:$0xff] }
  0x99   :  { %556 = vmatmul.mubr.f32.vlgmr.msra.gmra.mxu1 %v144_v7  ;;  %1281 = vmatprep.subr.mxu0 %v1647_v9  ;;  %v753_v7 = vld [vmem:[#allocation10 + $0x18] sm:$0xff] }
  0x9a   :  { %1316 = vmatprep.subr.mxu1 %v1647_v9  ;;  %1282 = vmatpush3.msra.mxu0 %v577_v8  ;;  %v1051_v8 = vld [vmem:[%s1874_s4] ss:$0 sm:$0xff] }
  0x9b   :  { %1283 = vmatprep.subr.mxu0 %v1647_v9  ;;  %1313 = vmatprep.mubr.msk.f32.mxu0 %vm1648_vm0, %v1647_v9 }
  0x9c   :  { %1284 = vmatpush3.msra.mxu0 %v576_v10  ;;  %1348 = vmatprep.mubr.msk.f32.mxu1 %vm1648_vm0, %v1647_v9 }
  0x9d   :  { %1285 = vmatprep.subr.mxu0 %v1647_v9  ;;  %1317 = vmatpush3.msra.mxu1 %v671_v25  ;;  %v851_v25 = vld [vmem:[#allocation11 + $0x38] sm:$0xff] }
  0x9e   :  { %1286 = vmatpush3.msra.mxu0 %v575_v11  ;;  %1318 = vmatprep.subr.mxu1 %v1647_v9 }
  0x9f   :  { %1287 = vmatprep.subr.mxu0 %v1647_v9  ;;  %1319 = vmatpush3.msra.mxu1 %v670_v26  ;;  %v850_v26 = vld [vmem:[#allocation11 + $0x30] sm:$0xff] }
  0xa0   :  { %1288 = vmatpush3.msra.mxu0 %v574_v12  ;;  %1320 = vmatprep.subr.mxu1 %v1647_v9 }
  0xa1   :  { %1289 = vmatprep.subr.mxu0 %v1647_v9  ;;  %1321 = vmatpush3.msra.mxu1 %v669_v27  ;;  %v849_v27 = vld [vmem:[#allocation11 + $0x28] sm:$0xff] }
  0xa2   :  { %1290 = vmatpush3.msra.mxu0 %v573_v13  ;;  %1322 = vmatprep.subr.mxu1 %v1647_v9 }
  0xa3   :  { %1291 = vmatprep.subr.mxu0 %v1647_v9  ;;  %1323 = vmatpush3.msra.mxu1 %v668_v28  ;;  %v848_v28 = vld [vmem:[#allocation11 + $0x20] sm:$0xff] }
  0xa4   :  { %1292 = vmatpush3.msra.mxu0 %v572_v14  ;;  %1324 = vmatprep.subr.mxu1 %v1647_v9  ;;  %v752_v14 = vld [vmem:[#allocation10 + $0x10] sm:$0xff] }
  0xa5   :  { %1293 = vmatprep.subr.mxu0 %v1647_v9  ;;  %1325 = vmatpush3.msra.mxu1 %v667_v29  ;;  %v847_v29 = vld [vmem:[#allocation11 + $0x18] sm:$0xff] }
  0xa6   :  { %1294 = vmatpush3.msra.mxu0 %v571_v15  ;;  %1326 = vmatprep.subr.mxu1 %v1647_v9  ;;  %v751_v15 = vld [vmem:[#allocation10 + $0x8] sm:$0xff] }
  0xa7   :  { %1295 = vmatprep.subr.mxu0 %v1647_v9  ;;  %1327 = vmatpush3.msra.mxu1 %v666_v30  ;;  %v1052_v30 = vld [vmem:[%s1876_s6] ss:$0 sm:$0xff] }
  0xa8   :  { %1296 = vmatpush3.msra.mxu0 %v570_v16  ;;  %1328 = vmatprep.subr.mxu1 %v1647_v9  ;;  %v750_v16 = vld [vmem:[#allocation10] sm:$0xff] }
  0xa9   :  { %1297 = vmatprep.subr.mxu0 %v1647_v9  ;;  %1329 = vmatpush3.msra.mxu1 %v665_v31 }
  0xaa   :  { %1298 = vmatpush3.msra.mxu0 %v569_v17  ;;  %1330 = vmatprep.subr.mxu1 %v1647_v9  ;;  %v859_v17 = vld [vmem:[#allocation11 + $0x78] sm:$0xff] }
  0xab   :  { %1299 = vmatprep.subr.mxu0 %v1647_v9  ;;  %1331 = vmatpush3.msra.mxu1 %v664_v32 }
  0xac   :  { %1300 = vmatpush3.msra.mxu0 %v568_v18  ;;  %1332 = vmatprep.subr.mxu1 %v1647_v9  ;;  %v858_v18 = vld [vmem:[#allocation11 + $0x70] sm:$0xff] }
  0xad   :  { %1301 = vmatprep.subr.mxu0 %v1647_v9  ;;  %1333 = vmatpush3.msra.mxu1 %v663_v33 }
  0xae   :  { %1302 = vmatpush3.msra.mxu0 %v567_v19  ;;  %1334 = vmatprep.subr.mxu1 %v1647_v9  ;;  %v857_v19 = vld [vmem:[#allocation11 + $0x68] sm:$0xff] }
  0xaf   :  { %1303 = vmatprep.subr.mxu0 %v1647_v9  ;;  %1335 = vmatpush3.msra.mxu1 %v662_v34 }
  0xb0   :  { %1304 = vmatpush3.msra.mxu0 %v566_v20  ;;  %1336 = vmatprep.subr.mxu1 %v1647_v9  ;;  %v856_v20 = vld [vmem:[#allocation11 + $0x60] sm:$0xff] }
  0xb1   :  { %1305 = vmatprep.subr.mxu0 %v1647_v9  ;;  %1337 = vmatpush3.msra.mxu1 %v661_v35  ;;  %v846_v35 = vld [vmem:[#allocation11 + $0x10] sm:$0xff] }
  0xb2   :  { %1306 = vmatpush3.msra.mxu0 %v565_v21  ;;  %1338 = vmatprep.subr.mxu1 %v1647_v9  ;;  %v855_v21 = vld [vmem:[#allocation11 + $0x58] sm:$0xff] }
  0xb3   :  { %1307 = vmatprep.subr.mxu0 %v1647_v9  ;;  %1339 = vmatpush3.msra.mxu1 %v660_v36  ;;  %v845_v36 = vld [vmem:[#allocation11 + $0x8] sm:$0xff] }
  0xb4   :  { %1308 = vmatpush3.msra.mxu0 %v564_v22  ;;  %1340 = vmatprep.subr.mxu1 %v1647_v9  ;;  %v854_v22 = vld [vmem:[#allocation11 + $0x50] sm:$0xff] }
  0xb5   :  { %1309 = vmatprep.subr.mxu0 %v1647_v9  ;;  %1341 = vmatpush3.msra.mxu1 %v659_v37  ;;  %v844_v37 = vld [vmem:[#allocation11] sm:$0xff] }
  0xb6   :  { %1310 = vmatpush3.msra.mxu0 %v563_v23  ;;  %1342 = vmatprep.subr.mxu1 %v1647_v9  ;;  %v853_v23 = vld [vmem:[#allocation11 + $0x48] sm:$0xff] }
  0xb7   :  { %1311 = vmatprep.subr.mxu0 %v1647_v9  ;;  %1343 = vmatpush3.msra.mxu1 %v658_v56  ;;  %v940_v56 = vld [vmem:[#allocation13 + $0x10] sm:$0xff] }
  0xb8   :  { %1312 = vmatpush3.msra.mxu0 %v562_v24  ;;  %1344 = vmatprep.subr.mxu1 %v1647_v9  ;;  %v852_v24 = vld [vmem:[#allocation11 + $0x40] sm:$0xff] }
  0xb9   :  { %1351 = vmatprep.subr.mxu0 %v1647_v9  ;;  %1345 = vmatpush3.msra.mxu1 %v657_v57  ;;  %v939_v57 = vld [vmem:[#allocation13 + $0x8] sm:$0xff] }
  0xba   :  { %1346 = vmatprep.subr.mxu1 %v1647_v9 }
  0xbb   :  { %1347 = vmatpush3.msra.mxu1 %v656_v58  ;;  %v938_v58 = vld [vmem:[#allocation13] sm:$0xff] }
  0xbc   :  { %1386 = vmatprep.subr.mxu1 %v1647_v9 }
 0x136   :  { %v1088_v38 = vpop.f32.mrf.mxu0 }
 0x138   :  { %v1123_v39 = vpop.f32.mrf.mxu1  ;;  %v1089_v40 = vpop.f32.mrf.mxu0 }
 0x139   :  { %v1090_v41 = vadd.f32 %v1089_v40, %v1088_v38  ;;  %v953_v38 = vld [vmem:[#allocation13 + $0x78] sm:$0xff]  ;;  %v951_v40 = vld [vmem:[#allocation13 + $0x68] sm:$0xff] }
 0x13a   :  { %v1124_v43 = vpop.f32.mrf.mxu1 }
 0x13b   :  { %v348_v44 = vadd.f32 %v1090_v41, %v1050_v42  ;;  %v1125_v45 = vadd.f32 %v1124_v43, %v1123_v39  ;;  %v952_v39 = vld [vmem:[#allocation13 + $0x70] sm:$0xff]  ;;  %v950_v41 = vld [vmem:[#allocation13 + $0x60] sm:$0xff]  ;;  %v949_v42 = vld [vmem:[#allocation13 + $0x58] sm:$0xff] }
 0x13c   :  { %v948_v43 = vld [vmem:[#allocation13 + $0x50] sm:$0xff] }
 0x13d   :  { %v418_v50 = vadd.f32 %v1125_v45, %v348_v44  ;;  %v947_v44 = vld [vmem:[#allocation13 + $0x48] sm:$0xff]  ;;  %v946_v45 = vld [vmem:[#allocation13 + $0x40] sm:$0xff] }
 0x158   :  { %v1158_v46 = vpop.f32.mrf.mxu0 }
 0x159   :  { %v1193_v47 = vpop.f32.mrf.mxu1 }
 0x15a   :  { %v1159_v48 = vpop.f32.mrf.mxu0 }
 0x15b   :  { %v1194_v49 = vpop.f32.mrf.mxu1  ;;  %v1160_v51 = vadd.f32 %v1159_v48, %v1158_v46  ;;  %v945_v46 = vld [vmem:[#allocation13 + $0x38] sm:$0xff]  ;;  %v943_v48 = vld [vmem:[#allocation13 + $0x28] sm:$0xff] }
 0x15c   :  { %v1195_v53 = vadd.f32 %v1194_v49, %v1193_v47  ;;  %v944_v47 = vld [vmem:[#allocation13 + $0x30] sm:$0xff]  ;;  %v942_v49 = vld [vmem:[#allocation13 + $0x20] sm:$0xff] }
 0x15d   :  { %v488_v52 = vadd.f32 %v1160_v51, %v418_v50  ;;  %v941_v50 = vld [vmem:[#allocation13 + $0x18] sm:$0xff]  ;;  %v1053_v51 = vld [vmem:[%s1878_s8] ss:$0 sm:$0xff] }
 0x15f   :  { %v558_v54 = vadd.f32 %v1195_v53, %v488_v52 }
 0x161   :  { %v561_v55 = vmax.f32 %v558_v54, 0.0 }
 0x163   :  { %1314 = vmatmul.mubr.f32.vlgmr.msra.gmra.mxu0 %v561_v55 }
 0x164   :  { %1383 = vmatprep.mubr.msk.f32.mxu0 %vm1648_vm0, %v1647_v9  ;;  %1352 = vmatpush3.msra.mxu0 %v765_v59  ;;  %v1054_v59 = vld [vmem:[%s1880_s10] ss:$0 sm:$0xff] }
 0x165   :  { %1353 = vmatprep.subr.mxu0 %v1647_v9 }
 0x166   :  { %1354 = vmatpush3.msra.mxu0 %v764_v60 }
 0x167   :  { %1355 = vmatprep.subr.mxu0 %v1647_v9 }
 0x168   :  { %1356 = vmatpush3.msra.mxu0 %v763_v61 }
 0x169   :  { %1357 = vmatprep.subr.mxu0 %v1647_v9 }
 0x16a   :  { %1358 = vmatpush3.msra.mxu0 %v762_v62 }
 0x16b   :  { %1359 = vmatprep.subr.mxu0 %v1647_v9 }
 0x16c   :  { %1360 = vmatpush3.msra.mxu0 %v761_v63 }
 0x16d   :  { %1361 = vmatprep.subr.mxu0 %v1647_v9 }
 0x16e   :  { %1362 = vmatpush3.msra.mxu0 %v760_v0  ;;  %v1055_v0 = vld [vmem:[%s1882_s12] ss:$0 sm:$0xff] }
 0x16f   :  { %1363 = vmatprep.subr.mxu0 %v1647_v9 }
 0x170   :  { %1364 = vmatpush3.msra.mxu0 %v759_v1 }
 0x171   :  { %1365 = vmatprep.subr.mxu0 %v1647_v9 }
 0x172   :  { %1366 = vmatpush3.msra.mxu0 %v758_v2 }
 0x173   :  { %1367 = vmatprep.subr.mxu0 %v1647_v9 }
 0x174   :  { %1368 = vmatpush3.msra.mxu0 %v757_v3 }
 0x175   :  { %1369 = vmatprep.subr.mxu0 %v1647_v9 }
 0x176   :  { %1370 = vmatpush3.msra.mxu0 %v756_v4 }
 0x177   :  { %1371 = vmatprep.subr.mxu0 %v1647_v9 }
 0x178   :  { %1372 = vmatpush3.msra.mxu0 %v755_v5 }
 0x179   :  { %1373 = vmatprep.subr.mxu0 %v1647_v9 }
 0x17a   :  { %1374 = vmatpush3.msra.mxu0 %v754_v6 }
 0x17b   :  { %1375 = vmatprep.subr.mxu0 %v1647_v9 }
 0x17c   :  { %1376 = vmatpush3.msra.mxu0 %v753_v7 }
 0x17d   :  { %1377 = vmatprep.subr.mxu0 %v1647_v9 }
 0x17e   :  { %1378 = vmatpush3.msra.mxu0 %v752_v14 }
 0x17f   :  { %1379 = vmatprep.subr.mxu0 %v1647_v9 }
 0x180   :  { %1380 = vmatpush3.msra.mxu0 %v751_v15 }
 0x181   :  { %1381 = vmatprep.subr.mxu0 %v1647_v9 }
 0x182   :  { %1382 = vmatpush3.msra.mxu0 %v750_v16 }
 0x183   :  { %1421 = vmatprep.subr.mxu0 %v1647_v9 }
 0x223   :  { %v651_v10 = vpop.f32.mrf.mxu0 }
 0x224   :  { %v652_v11 = vadd.f32 %v1051_v8, %v651_v10 }
 0x225   :  { %v1315_v12 = vpop.f32.mrf.mxu0 }
 0x226   :  { %v655_v13 = vmax.f32 %v652_v11, 0.0 }
 0x228   :  { %1349 = vmatmul.mubr.f32.vlgmr.msra.gmra.mxu1 %v655_v13 }
 0x229   :  { %1418 = vmatprep.mubr.msk.f32.mxu1 %vm1648_vm0, %v1647_v9  ;;  %1387 = vmatpush3.msra.mxu1 %v859_v17 }
 0x22a   :  { %1388 = vmatprep.subr.mxu1 %v1647_v9 }
 0x22b   :  { %1389 = vmatpush3.msra.mxu1 %v858_v18 }
 0x22c   :  { %1390 = vmatprep.subr.mxu1 %v1647_v9 }
 0x22d   :  { %1391 = vmatpush3.msra.mxu1 %v857_v19 }
 0x22e   :  { %1392 = vmatprep.subr.mxu1 %v1647_v9 }
 0x22f   :  { %1393 = vmatpush3.msra.mxu1 %v856_v20 }
 0x230   :  { %1394 = vmatprep.subr.mxu1 %v1647_v9 }
 0x231   :  { %1395 = vmatpush3.msra.mxu1 %v855_v21 }
 0x232   :  { %1396 = vmatprep.subr.mxu1 %v1647_v9 }
 0x233   :  { %1397 = vmatpush3.msra.mxu1 %v854_v22 }
 0x234   :  { %1398 = vmatprep.subr.mxu1 %v1647_v9 }
 0x235   :  { %1399 = vmatpush3.msra.mxu1 %v853_v23 }
 0x236   :  { %1400 = vmatprep.subr.mxu1 %v1647_v9 }
 0x237   :  { %1401 = vmatpush3.msra.mxu1 %v852_v24 }
 0x238   :  { %1402 = vmatprep.subr.mxu1 %v1647_v9 }
 0x239   :  { %1403 = vmatpush3.msra.mxu1 %v851_v25 }
 0x23a   :  { %1404 = vmatprep.subr.mxu1 %v1647_v9 }
 0x23b   :  { %1405 = vmatpush3.msra.mxu1 %v850_v26 }
 0x23c   :  { %1406 = vmatprep.subr.mxu1 %v1647_v9 }
 0x23d   :  { %1407 = vmatpush3.msra.mxu1 %v849_v27 }
 0x23e   :  { %1408 = vmatprep.subr.mxu1 %v1647_v9 }
 0x23f   :  { %1409 = vmatpush3.msra.mxu1 %v848_v28 }
 0x240   :  { %1410 = vmatprep.subr.mxu1 %v1647_v9 }
 0x241   :  { %1411 = vmatpush3.msra.mxu1 %v847_v29 }
 0x242   :  { %1412 = vmatprep.subr.mxu1 %v1647_v9 }
 0x243   :  { %1413 = vmatpush3.msra.mxu1 %v846_v35 }
 0x244   :  { %1414 = vmatprep.subr.mxu1 %v1647_v9 }
 0x245   :  { %1415 = vmatpush3.msra.mxu1 %v845_v36 }
 0x246   :  { %1416 = vmatprep.subr.mxu1 %v1647_v9 }
 0x247   :  { %1417 = vmatpush3.msra.mxu1 %v844_v37 }
 0x2e8   :  { %v745_v31 = vpop.f32.mrf.mxu1 }
 0x2e9   :  { %v746_v32 = vadd.f32 %v1052_v30, %v745_v31 }
 0x2ea   :  { %v1350_v33 = vpop.f32.mrf.mxu1 }
 0x2eb   :  { %v749_v34 = vmax.f32 %v746_v32, 0.0 }
 0x2ed   :  { %1384 = vmatmul.mubr.f32.vlgmr.msra.gmra.mxu0 %v749_v34 }
 0x2ee   :  { %1453 = vmatprep.mubr.msk.f32.mxu0 %vm1648_vm0, %v1647_v9  ;;  %1422 = vmatpush3.msra.mxu0 %v953_v38 }
 0x2ef   :  { %1423 = vmatprep.subr.mxu0 %v1647_v9 }
 0x2f0   :  { %1424 = vmatpush3.msra.mxu0 %v952_v39 }
 0x2f1   :  { %1425 = vmatprep.subr.mxu0 %v1647_v9 }
 0x2f2   :  { %1426 = vmatpush3.msra.mxu0 %v951_v40 }
 0x2f3   :  { %1427 = vmatprep.subr.mxu0 %v1647_v9 }
 0x2f4   :  { %1428 = vmatpush3.msra.mxu0 %v950_v41 }
 0x2f5   :  { %1429 = vmatprep.subr.mxu0 %v1647_v9 }
 0x2f6   :  { %1430 = vmatpush3.msra.mxu0 %v949_v42 }
 0x2f7   :  { %1431 = vmatprep.subr.mxu0 %v1647_v9 }
 0x2f8   :  { %1432 = vmatpush3.msra.mxu0 %v948_v43 }
 0x2f9   :  { %1433 = vmatprep.subr.mxu0 %v1647_v9 }
 0x2fa   :  { %1434 = vmatpush3.msra.mxu0 %v947_v44 }
 0x2fb   :  { %1435 = vmatprep.subr.mxu0 %v1647_v9 }
 0x2fc   :  { %1436 = vmatpush3.msra.mxu0 %v946_v45 }
 0x2fd   :  { %1437 = vmatprep.subr.mxu0 %v1647_v9 }
 0x2fe   :  { %1438 = vmatpush3.msra.mxu0 %v945_v46 }
 0x2ff   :  { %1439 = vmatprep.subr.mxu0 %v1647_v9 }
 0x300   :  { %1440 = vmatpush3.msra.mxu0 %v944_v47 }
 0x301   :  { %1441 = vmatprep.subr.mxu0 %v1647_v9 }
 0x302   :  { %1442 = vmatpush3.msra.mxu0 %v943_v48 }
 0x303   :  { %1443 = vmatprep.subr.mxu0 %v1647_v9 }
 0x304   :  { %1444 = vmatpush3.msra.mxu0 %v942_v49 }
 0x305   :  { %1445 = vmatprep.subr.mxu0 %v1647_v9 }
 0x306   :  { %1446 = vmatpush3.msra.mxu0 %v941_v50 }
 0x307   :  { %1447 = vmatprep.subr.mxu0 %v1647_v9 }
 0x308   :  { %1448 = vmatpush3.msra.mxu0 %v940_v56 }
 0x309   :  { %1449 = vmatprep.subr.mxu0 %v1647_v9 }
 0x30a   :  { %1450 = vmatpush3.msra.mxu0 %v939_v57 }
 0x30b   :  { %1451 = vmatprep.subr.mxu0 %v1647_v9 }
 0x30c   :  { %1452 = vmatpush3.msra.mxu0 %v938_v58 }
 0x3ad   :  { %v839_v52 = vpop.f32.mrf.mxu0 }
 0x3ae   :  { %v840_v53 = vadd.f32 %v1053_v51, %v839_v52 }
 0x3af   :  { %v1385_v54 = vpop.f32.mrf.mxu0 }
 0x3b0   :  { %v843_v55 = vmax.f32 %v840_v53, 0.0 }
 0x3b2   :  { %1419 = vmatmul.mubr.f32.vlgmr.msra.gmra.mxu1 %v843_v55 }
 0x472   :  { %v933_v60 = vpop.f32.mrf.mxu1 }
 0x473   :  { %v934_v61 = vadd.f32 %v1054_v59, %v933_v60 }
 0x474   :  { %v1420_v62 = vpop.f32.mrf.mxu1 }
 0x475   :  { %v937_v63 = vmax.f32 %v934_v61, 0.0 }
 0x477   :  { %1454 = vmatmul.mubr.f32.vlgmr.msra.gmra.mxu0 %v937_v63 }
 0x537   :  { %v1027_v1 = vpop.f32.mrf.mxu0 }
 0x538   :  { %v1028_v2 = vadd.f32 %v1055_v0, %v1027_v1 }
 0x539   :  { %v1455_v9 = vpop.f32.mrf.mxu0 }
 0x53a   :  { %1031 = vst [vmem:[#allocation14] sm:$0xff] %v1028_v2 }
 0x53b   :  { %1619 = shalt.err (!%p1616_p11)
}
 0x53c   :  { %1041 = dma.vmem_to_hbm [thread:$0]  %s1039_s30, 128, %s1883_s13, [#allocation4]  }
 0x53d   :  { %1636 = dma.done.wait [#allocation4], 128  }
 0x53e   :  { %1637 = vsyncadd [#allocation4], 4294967168 }
 0x53f   :  { %1045 = vsyncpa [#allocation3], 1 }
 0x540   :  { %1046 = vsyncpa [#allocation6], 1 }
 0x541   :  { %1047 = vsyncpa [#allocation9], 1 }
 0x542   :  { %1048 = vsyncpa [#allocation12], 1 }
 0x543   :  { %1049 = vsyncpa [#allocation4], 1 }

// kernel: tpu_custom_call.1
= control target key start
LH: loop header
LB: loop body
LE: loop exit
PB: predicated region body
PF: predicated region fallthrough
CT: control target
= control target key end

     0   :  { %18 = vsyncpa [#allocation3], 0  ;;  %s1870_s0 = inlined_call_operand.hbm [shape: f32[8,1024], index: 0, kind: input, shape index: {}]   ;;  %s1871_s1 = inlined_call_operand.hbm [shape: f32[1024,128], index: 1, kind: input, shape index: {}]   ;;  %s1872_s2 = inlined_call_operand.vmem [shape: f32[1,128], index: 2, kind: input, shape index: {}]   ;;  %s1873_s3 = inlined_call_operand.hbm [shape: f32[128,128], index: 3, kind: input, shape index: {}]   ;;  %s1874_s4 = inlined_call_operand.vmem [shape: f32[1,128], index: 4, kind: input, shape index: {}]   ;;  %s1875_s5 = inlined_call_operand.hbm [shape: f32[128,128], index: 5, kind: input, shape index: {}]   ;;  %s1876_s6 = inlined_call_operand.vmem [shape: f32[1,128], index: 6, kind: input, shape index: {}]   ;;  %s1877_s7 = inlined_call_operand.hbm [shape: f32[128,128], index: 7, kind: input, shape index: {}]   ;;  %s1878_s8 = inlined_call_operand.vmem [shape: f32[1,128], index: 8, kind: input, shape index: {}]   ;;  %s1879_s9 = inlined_call_operand.hbm [shape: f32[128,128], index: 9, kind: input, shape index: {}]   ;;  %s1880_s10 = inlined_call_operand.vmem [shape: f32[1,128], index: 10, kind: input, shape index: {}]   ;;  %s1881_s11 = inlined_call_operand.hbm [shape: f32[128,128], index: 11, kind: input, shape index: {}]   ;;  %s1882_s12 = inlined_call_operand.vmem [shape: f32[1,128], index: 12, kind: input, shape index: {}]   ;;  %s1883_s13 = inlined_call_operand.hbm [shape: f32[8,128], index: 13, kind: output, shape index: {}]  }
   0x1   :  { %19 = vsyncpa [#allocation6], 0 }
   0x2   :  { %20 = vsyncpa [#allocation9], 0 }
   0x3   :  { %21 = vsyncpa [#allocation12], 0 }
   0x4   :  { %22 = vsyncpa [#allocation4], 0  ;;  %s1638_s25 = smov [#allocation5]  }
   0x5   :  { %s38_s26 = sshll.u32 %s1638_s25, 4  ;;  %s39_s26 = int_to_ptr.vmem [resolvable:$true] %s38_s26 }
   0x6   :  { %s1476_s27 = scalar_lea.vmem %s39_s26, 16384  ;;  %p1481_p1 = scmp.lt.s32.totalorder %s39_s26, %s39_s26 }
   0x7   :  { %p1477_p0 = scmp.ne.s32.totalorder %s39_s26, %s1476_s27  ;;  %p1482_p2 = scmp.lt.s32.totalorder %s1476_s27, %s1476_s27 }
   0x9   :  { %p1483_p3 = por %p1482_p2, %p1481_p1 }
   0xb   :  { %p1484_p4 = pnand %p1483_p3, %p1477_p0 }
   0xd   :  { %1487 = shalt.err (!%p1484_p4)
}
   0xe   :  { %s1639_s28 = smov 128   ;;  %s1640_s29 = smov 8  }
   0xf   :  { %44 = dma.hbm_to_vmem [thread:$0]  %s1871_s1, 16384, %s39_s26, [#allocation6], %s1639_s28, %s1639_s28, %s1640_s29  }
  0x10   :  { %s1641_s15 = smov [#allocation8]   ;;  %s1642_s17 = smov [#allocation11]  }
  0x11   :  { %s66_s16 = sshll.u32 %s1641_s15, 4  ;;  %s94_s18 = sshll.u32 %s1642_s17, 4  ;;  %s67_s16 = int_to_ptr.vmem [resolvable:$true] %s66_s16  ;;  %s95_s18 = int_to_ptr.vmem [resolvable:$true] %s94_s18 }
  0x12   :  { %s1496_s19 = scalar_lea.vmem %s67_s16, 2048  ;;  %p1501_p6 = scmp.lt.s32.totalorder %s67_s16, %s67_s16 }
  0x13   :  { %p1497_p5 = scmp.ne.s32.totalorder %s67_s16, %s1496_s19  ;;  %p1502_p7 = scmp.lt.s32.totalorder %s1496_s19, %s1496_s19 }
  0x15   :  { %p1503_p8 = por %p1502_p7, %p1501_p6 }
  0x17   :  { %p1504_p9 = pnand %p1503_p8, %p1497_p5 }
  0x19   :  { %1507 = shalt.err (!%p1504_p9)
}
  0x1a   :  { %72 = dma.hbm_to_vmem [thread:$0]  %s1875_s5, 2048, %s67_s16, [#allocation9], %s1639_s28, %s1639_s28, %s1640_s29  }
  0x1b   :  { %s1516_s1 = scalar_lea.vmem %s95_s18, 2048  ;;  %p1521_p11 = scmp.lt.s32.totalorder %s95_s18, %s95_s18 }
  0x1c   :  { %p1517_p10 = scmp.ne.s32.totalorder %s95_s18, %s1516_s1  ;;  %p1522_p12 = scmp.lt.s32.totalorder %s1516_s1, %s1516_s1 }
  0x1e   :  { %p1523_p13 = por %p1522_p12, %p1521_p11 }
  0x20   :  { %p1524_p0 = pnand %p1523_p13, %p1517_p10 }
  0x22   :  { %1527 = shalt.err (!%p1524_p0)
}
  0x23   :  { %100 = dma.hbm_to_vmem [thread:$0]  %s1879_s9, 2048, %s95_s18, [#allocation12], %s1639_s28, %s1639_s28, %s1640_s29  }
  0x24   :  { %s1643_s24 = smov [#allocation2]   ;;  %s1644_s26 = smov [#allocation7]  }
  0x25   :  { %s29_s25 = sshll.u32 %s1643_s24, 4  ;;  %s52_s5 = sshll.u32 %s1644_s26, 4  ;;  %s30_s25 = int_to_ptr.vmem [resolvable:$true] %s29_s25  ;;  %s53_s5 = int_to_ptr.vmem [resolvable:$true] %s52_s5 }
  0x26   :  { %s1536_s27 = scalar_lea.vmem %s30_s25, 1024  ;;  %p1541_p2 = scmp.lt.s32.totalorder %s30_s25, %s30_s25 }
  0x27   :  { %p1537_p1 = scmp.ne.s32.totalorder %s30_s25, %s1536_s27  ;;  %p1542_p3 = scmp.lt.s32.totalorder %s1536_s27, %s1536_s27 }
  0x29   :  { %p1543_p4 = por %p1542_p3, %p1541_p2 }
  0x2b   :  { %p1544_p5 = pnand %p1543_p4, %p1537_p1 }
  0x2d   :  { %1547 = shalt.err (!%p1544_p5)
}
  0x2e   :  { %32 = dma.hbm_to_vmem [thread:$0]  %s1870_s0, 1024, %s30_s25, [#allocation3]  }
  0x2f   :  { %s1556_s15 = scalar_lea.vmem %s53_s5, 2048  ;;  %p1561_p7 = scmp.lt.s32.totalorder %s53_s5, %s53_s5 }
  0x30   :  { %p1557_p6 = scmp.ne.s32.totalorder %s53_s5, %s1556_s15  ;;  %p1562_p8 = scmp.lt.s32.totalorder %s1556_s15, %s1556_s15 }
  0x32   :  { %p1563_p9 = por %p1562_p8, %p1561_p7 }
  0x34   :  { %p1564_p10 = pnand %p1563_p9, %p1557_p6 }
  0x36   :  { %1567 = shalt.err (!%p1564_p10)
}
  0x37   :  { %58 = dma.hbm_to_vmem [thread:$0]  %s1873_s3, 2048, %s53_s5, [#allocation6], %s1639_s28, %s1639_s28, %s1640_s29  }
  0x38   :  { %s1645_s17 = smov [#allocation10]   ;;  %s1646_s19 = smov [#allocation13]  }
  0x39   :  { %s80_s18 = sshll.u32 %s1645_s17, 4  ;;  %s108_s0 = sshll.u32 %s1646_s19, 4  ;;  %s81_s18 = int_to_ptr.vmem [resolvable:$true] %s80_s18  ;;  %s109_s0 = int_to_ptr.vmem [resolvable:$true] %s108_s0 }
  0x3a   :  { %s1576_s20 = scalar_lea.vmem %s81_s18, 2048  ;;  %p1581_p12 = scmp.lt.s32.totalorder %s81_s18, %s81_s18 }
  0x3b   :  { %p1577_p11 = scmp.ne.s32.totalorder %s81_s18, %s1576_s20  ;;  %p1582_p13 = scmp.lt.s32.totalorder %s1576_s20, %s1576_s20 }
  0x3d   :  { %p1583_p0 = por %p1582_p13, %p1581_p12 }
  0x3f   :  { %p1584_p1 = pnand %p1583_p0, %p1577_p11 }
  0x41   :  { %1587 = shalt.err (!%p1584_p1)
}
  0x42   :  { %86 = dma.hbm_to_vmem [thread:$0]  %s1877_s7, 2048, %s81_s18, [#allocation9], %s1639_s28, %s1639_s28, %s1640_s29  }
  0x43   :  { %s1596_s3 = scalar_lea.vmem %s109_s0, 2048  ;;  %p1601_p3 = scmp.lt.s32.totalorder %s109_s0, %s109_s0 }
  0x44   :  { %p1597_p2 = scmp.ne.s32.totalorder %s109_s0, %s1596_s3  ;;  %p1602_p4 = scmp.lt.s32.totalorder %s1596_s3, %s1596_s3 }
  0x46   :  { %p1603_p5 = por %p1602_p4, %p1601_p3 }
  0x48   :  { %p1604_p6 = pnand %p1603_p5, %p1597_p2 }
  0x4a   :  { %1607 = shalt.err (!%p1604_p6)
}
  0x4b   :  { %114 = dma.hbm_to_vmem [thread:$0]  %s1881_s11, 2048, %s109_s0, [#allocation12], %s1639_s28, %s1639_s28, %s1640_s29  }
  0x4c   :  { %1628 = dma.done.wait [#allocation3], 1024  }
  0x4d   :  { %1629 = vsyncadd [#allocation3], 4294966272 }
  0x4e   :  { %1630 = dma.done.wait [#allocation6], 18432  }
  0x4f   :  { %1631 = vsyncadd [#allocation6], 4294948864 }
  0x50   :  { %1632 = dma.done.wait [#allocation9], 4096  }
  0x51   :  { %1633 = vsyncadd [#allocation9], 4294963200 }
  0x52   :  { %1634 = dma.done.wait [#allocation12], 4096  }
  0x53   :  { %1635 = vsyncadd [#allocation12], 4294963200  ;;  %v177_v0 = vld [vmem:[#allocation5 + $0xf8] sm:$0xff]  ;;  %v176_v4 = vld [vmem:[#allocation5 + $0xf0] sm:$0xff]  ;;  %vm1648_vm0 = vmmov 0   ;;  %s1649_s27 = smov [#allocation14]  }
  0x54   :  { %v209_v1 = vld [vmem:[#allocation5 + $0x1f8] sm:$0xff]  ;;  %1056 = vmatprep.subr.mxu0 %v177_v0  ;;  %v208_v5 = vld [vmem:[#allocation5 + $0x1f0] sm:$0xff]  ;;  %v175_v8 = vld [vmem:[#allocation5 + $0xe8] sm:$0xff]  ;;  %s1038_s30 = sshll.u32 %s1649_s27, 4  ;;  %s1039_s30 = int_to_ptr.vmem [resolvable:$true] %s1038_s30 }
  0x55   :  { %v161_v2 = vld [vmem:[#allocation5 + $0x78] sm:$0xff]  ;;  %1091 = vmatprep.subr.mxu1 %v209_v1  ;;  %v160_v6 = vld [vmem:[#allocation5 + $0x70] sm:$0xff]  ;;  %v207_v9 = vld [vmem:[#allocation5 + $0x1e8] sm:$0xff]  ;;  %s1608_s14 = scalar_lea.vmem %s1039_s30, 128  ;;  %p1613_p8 = scmp.lt.s32.totalorder %s1039_s30, %s1039_s30 }
  0x56   :  { %v193_v3 = vld [vmem:[#allocation5 + $0x178] sm:$0xff]  ;;  %1057 = vmatpush3.msra.mxu0 %v161_v2  ;;  %v192_v7 = vld [vmem:[#allocation5 + $0x170] sm:$0xff]  ;;  %v159_v10 = vld [vmem:[#allocation5 + $0x68] sm:$0xff]  ;;  %p1609_p7 = scmp.ne.s32.totalorder %s1039_s30, %s1608_s14  ;;  %p1614_p9 = scmp.lt.s32.totalorder %s1608_s14, %s1608_s14 }
  0x57   :  { %1092 = vmatpush3.msra.mxu1 %v193_v3  ;;  %1058 = vmatprep.subr.mxu0 %v176_v4  ;;  %v191_v11 = vld [vmem:[#allocation5 + $0x168] sm:$0xff]  ;;  %v174_v12 = vld [vmem:[#allocation5 + $0xe0] sm:$0xff]  ;;  %v173_v16 = vld [vmem:[#allocation5 + $0xd8] sm:$0xff] }
  0x58   :  { %1093 = vmatprep.subr.mxu1 %v208_v5  ;;  %1059 = vmatpush3.msra.mxu0 %v160_v6  ;;  %v206_v13 = vld [vmem:[#allocation5 + $0x1e0] sm:$0xff]  ;;  %v205_v17 = vld [vmem:[#allocation5 + $0x1d8] sm:$0xff]  ;;  %v172_v20 = vld [vmem:[#allocation5 + $0xd0] sm:$0xff]  ;;  %p1615_p10 = por %p1614_p9, %p1613_p8 }
  0x59   :  { %1094 = vmatpush3.msra.mxu1 %v192_v7  ;;  %1060 = vmatprep.subr.mxu0 %v175_v8  ;;  %v158_v14 = vld [vmem:[#allocation5 + $0x60] sm:$0xff]  ;;  %v157_v18 = vld [vmem:[#allocation5 + $0x58] sm:$0xff]  ;;  %v204_v21 = vld [vmem:[#allocation5 + $0x1d0] sm:$0xff] }
  0x5a   :  { %1095 = vmatprep.subr.mxu1 %v207_v9  ;;  %v190_v15 = vld [vmem:[#allocation5 + $0x160] sm:$0xff]  ;;  %1061 = vmatpush3.msra.mxu0 %v159_v10  ;;  %v189_v19 = vld [vmem:[#allocation5 + $0x158] sm:$0xff]  ;;  %v156_v22 = vld [vmem:[#allocation5 + $0x50] sm:$0xff]  ;;  %p1616_p11 = pnand %p1615_p10, %p1609_p7 }
  0x5b   :  { %1096 = vmatpush3.msra.mxu1 %v191_v11  ;;  %1062 = vmatprep.subr.mxu0 %v174_v12  ;;  %v188_v23 = vld [vmem:[#allocation5 + $0x150] sm:$0xff]  ;;  %v171_v24 = vld [vmem:[#allocation5 + $0xc8] sm:$0xff]  ;;  %v170_v28 = vld [vmem:[#allocation5 + $0xc0] sm:$0xff] }
  0x5c   :  { %1097 = vmatprep.subr.mxu1 %v206_v13  ;;  %1063 = vmatpush3.msra.mxu0 %v158_v14  ;;  %v203_v25 = vld [vmem:[#allocation5 + $0x1c8] sm:$0xff]  ;;  %v202_v29 = vld [vmem:[#allocation5 + $0x1c0] sm:$0xff]  ;;  %v169_v32 = vld [vmem:[#allocation5 + $0xb8] sm:$0xff] }
  0x5d   :  { %1098 = vmatpush3.msra.mxu1 %v190_v15  ;;  %1064 = vmatprep.subr.mxu0 %v173_v16  ;;  %v155_v26 = vld [vmem:[#allocation5 + $0x48] sm:$0xff]  ;;  %v154_v30 = vld [vmem:[#allocation5 + $0x40] sm:$0xff]  ;;  %v201_v33 = vld [vmem:[#allocation5 + $0x1b8] sm:$0xff] }
  0x5e   :  { %1099 = vmatprep.subr.mxu1 %v205_v17  ;;  %1065 = vmatpush3.msra.mxu0 %v157_v18  ;;  %v187_v27 = vld [vmem:[#allocation5 + $0x148] sm:$0xff]  ;;  %v186_v31 = vld [vmem:[#allocation5 + $0x140] sm:$0xff]  ;;  %v153_v34 = vld [vmem:[#allocation5 + $0x38] sm:$0xff] }
  0x5f   :  { %1100 = vmatpush3.msra.mxu1 %v189_v19  ;;  %1066 = vmatprep.subr.mxu0 %v172_v20  ;;  %v185_v35 = vld [vmem:[#allocation5 + $0x138] sm:$0xff]  ;;  %v168_v36 = vld [vmem:[#allocation5 + $0xb0] sm:$0xff]  ;;  %v167_v40 = vld [vmem:[#allocation5 + $0xa8] sm:$0xff] }
  0x60   :  { %1101 = vmatprep.subr.mxu1 %v204_v21  ;;  %1067 = vmatpush3.msra.mxu0 %v156_v22  ;;  %v200_v37 = vld [vmem:[#allocation5 + $0x1b0] sm:$0xff]  ;;  %v199_v41 = vld [vmem:[#allocation5 + $0x1a8] sm:$0xff]  ;;  %v166_v44 = vld [vmem:[#allocation5 + $0xa0] sm:$0xff] }
  0x61   :  { %1102 = vmatpush3.msra.mxu1 %v188_v23  ;;  %1068 = vmatprep.subr.mxu0 %v171_v24  ;;  %v152_v38 = vld [vmem:[#allocation5 + $0x30] sm:$0xff]  ;;  %v151_v42 = vld [vmem:[#allocation5 + $0x28] sm:$0xff]  ;;  %v198_v45 = vld [vmem:[#allocation5 + $0x1a0] sm:$0xff] }
  0x62   :  { %1103 = vmatprep.subr.mxu1 %v203_v25  ;;  %1069 = vmatpush3.msra.mxu0 %v155_v26  ;;  %v184_v39 = vld [vmem:[#allocation5 + $0x130] sm:$0xff]  ;;  %v183_v43 = vld [vmem:[#allocation5 + $0x128] sm:$0xff]  ;;  %v150_v46 = vld [vmem:[#allocation5 + $0x20] sm:$0xff] }
  0x63   :  { %1104 = vmatpush3.msra.mxu1 %v187_v27  ;;  %1070 = vmatprep.subr.mxu0 %v170_v28  ;;  %v182_v47 = vld [vmem:[#allocation5 + $0x120] sm:$0xff]  ;;  %v165_v48 = vld [vmem:[#allocation5 + $0x98] sm:$0xff]  ;;  %v164_v52 = vld [vmem:[#allocation5 + $0x90] sm:$0xff] }
  0x64   :  { %1105 = vmatprep.subr.mxu1 %v202_v29  ;;  %1071 = vmatpush3.msra.mxu0 %v154_v30  ;;  %v197_v49 = vld [vmem:[#allocation5 + $0x198] sm:$0xff]  ;;  %v196_v53 = vld [vmem:[#allocation5 + $0x190] sm:$0xff]  ;;  %v163_v56 = vld [vmem:[#allocation5 + $0x88] sm:$0xff] }
  0x65   :  { %1106 = vmatpush3.msra.mxu1 %v186_v31  ;;  %1072 = vmatprep.subr.mxu0 %v169_v32  ;;  %v149_v50 = vld [vmem:[#allocation5 + $0x18] sm:$0xff]  ;;  %v148_v54 = vld [vmem:[#allocation5 + $0x10] sm:$0xff]  ;;  %v195_v57 = vld [vmem:[#allocation5 + $0x188] sm:$0xff] }
  0x66   :  { %1107 = vmatprep.subr.mxu1 %v201_v33  ;;  %1073 = vmatpush3.msra.mxu0 %v153_v34  ;;  %v181_v51 = vld [vmem:[#allocation5 + $0x118] sm:$0xff]  ;;  %v180_v55 = vld [vmem:[#allocation5 + $0x110] sm:$0xff]  ;;  %v147_v58 = vld [vmem:[#allocation5 + $0x8] sm:$0xff] }
  0x67   :  { %1108 = vmatpush3.msra.mxu1 %v185_v35  ;;  %1074 = vmatprep.subr.mxu0 %v168_v36  ;;  %v179_v59 = vld [vmem:[#allocation5 + $0x108] sm:$0xff]  ;;  %v162_v60 = vld [vmem:[#allocation5 + $0x80] sm:$0xff]  ;;  %v141_v2 = vld [vmem:[#allocation2 + $0x18] sm:$0xff] }
  0x68   :  { %1109 = vmatprep.subr.mxu1 %v200_v37  ;;  %1075 = vmatpush3.msra.mxu0 %v152_v38  ;;  %v194_v61 = vld [vmem:[#allocation5 + $0x180] sm:$0xff]  ;;  %v139_v63 = vld [vmem:[#allocation2 + $0x8] sm:$0xff]  ;;  %v241_v3 = vld [vmem:[#allocation5 + $0x2f8] sm:$0xff] }
  0x69   :  { %1110 = vmatpush3.msra.mxu1 %v184_v39  ;;  %1076 = vmatprep.subr.mxu0 %v167_v40  ;;  %v146_v62 = vld [vmem:[#allocation5] sm:$0xff]  ;;  %v273_v4 = vld [vmem:[#allocation5 + $0x3f8] sm:$0xff]  ;;  %v140_v5 = vld [vmem:[#allocation2 + $0x10] sm:$0xff] }
  0x6a   :  { %1111 = vmatprep.subr.mxu1 %v199_v41  ;;  %1077 = vmatpush3.msra.mxu0 %v151_v42  ;;  %v178_v0 = vld [vmem:[#allocation5 + $0x100] sm:$0xff]  ;;  %v225_v6 = vld [vmem:[#allocation5 + $0x278] sm:$0xff]  ;;  %v240_v8 = vld [vmem:[#allocation5 + $0x2f0] sm:$0xff] }
  0x6b   :  { %1112 = vmatpush3.msra.mxu1 %v183_v43  ;;  %1078 = vmatprep.subr.mxu0 %v166_v44  ;;  %v138_v1 = vld [vmem:[#allocation2] sm:$0xff]  ;;  %v257_v7 = vld [vmem:[#allocation5 + $0x378] sm:$0xff]  ;;  %v272_v9 = vld [vmem:[#allocation5 + $0x3f0] sm:$0xff] }
  0x6c   :  { %1113 = vmatprep.subr.mxu1 %v198_v45  ;;  %1079 = vmatpush3.msra.mxu0 %v150_v46  ;;  %v224_v10 = vld [vmem:[#allocation5 + $0x270] sm:$0xff]  ;;  %v239_v12 = vld [vmem:[#allocation5 + $0x2e8] sm:$0xff]  ;;  %v238_v16 = vld [vmem:[#allocation5 + $0x2e0] sm:$0xff] }
  0x6d   :  { %1114 = vmatpush3.msra.mxu1 %v182_v47  ;;  %1080 = vmatprep.subr.mxu0 %v165_v48  ;;  %v256_v11 = vld [vmem:[#allocation5 + $0x370] sm:$0xff]  ;;  %v271_v13 = vld [vmem:[#allocation5 + $0x3e8] sm:$0xff]  ;;  %v270_v17 = vld [vmem:[#allocation5 + $0x3e0] sm:$0xff] }
  0x6e   :  { %1115 = vmatprep.subr.mxu1 %v197_v49  ;;  %1081 = vmatpush3.msra.mxu0 %v149_v50  ;;  %v223_v14 = vld [vmem:[#allocation5 + $0x268] sm:$0xff]  ;;  %v222_v18 = vld [vmem:[#allocation5 + $0x260] sm:$0xff]  ;;  %v237_v20 = vld [vmem:[#allocation5 + $0x2d8] sm:$0xff] }
  0x6f   :  { %1116 = vmatpush3.msra.mxu1 %v181_v51  ;;  %1082 = vmatprep.subr.mxu0 %v164_v52  ;;  %v255_v15 = vld [vmem:[#allocation5 + $0x368] sm:$0xff]  ;;  %v254_v19 = vld [vmem:[#allocation5 + $0x360] sm:$0xff]  ;;  %v269_v21 = vld [vmem:[#allocation5 + $0x3d8] sm:$0xff] }
  0x70   :  { %1117 = vmatprep.subr.mxu1 %v196_v53  ;;  %1083 = vmatpush3.msra.mxu0 %v148_v54  ;;  %v221_v22 = vld [vmem:[#allocation5 + $0x258] sm:$0xff]  ;;  %v236_v24 = vld [vmem:[#allocation5 + $0x2d0] sm:$0xff]  ;;  %v235_v28 = vld [vmem:[#allocation5 + $0x2c8] sm:$0xff] }
  0x71   :  { %1118 = vmatpush3.msra.mxu1 %v180_v55  ;;  %1084 = vmatprep.subr.mxu0 %v163_v56  ;;  %v253_v23 = vld [vmem:[#allocation5 + $0x358] sm:$0xff]  ;;  %v268_v25 = vld [vmem:[#allocation5 + $0x3d0] sm:$0xff]  ;;  %v267_v29 = vld [vmem:[#allocation5 + $0x3c8] sm:$0xff] }
  0x72   :  { %1119 = vmatprep.subr.mxu1 %v195_v57  ;;  %1085 = vmatpush3.msra.mxu0 %v147_v58  ;;  %v220_v26 = vld [vmem:[#allocation5 + $0x250] sm:$0xff]  ;;  %v219_v30 = vld [vmem:[#allocation5 + $0x248] sm:$0xff]  ;;  %v234_v32 = vld [vmem:[#allocation5 + $0x2c0] sm:$0xff] }
  0x73   :  { %1120 = vmatpush3.msra.mxu1 %v179_v59  ;;  %1086 = vmatprep.subr.mxu0 %v162_v60  ;;  %v252_v27 = vld [vmem:[#allocation5 + $0x350] sm:$0xff]  ;;  %v251_v31 = vld [vmem:[#allocation5 + $0x348] sm:$0xff]  ;;  %v266_v33 = vld [vmem:[#allocation5 + $0x3c0] sm:$0xff] }
  0x74   :  { %1121 = vmatprep.subr.mxu1 %v194_v61  ;;  %1087 = vmatpush3.msra.mxu0 %v146_v62  ;;  %v218_v34 = vld [vmem:[#allocation5 + $0x240] sm:$0xff]  ;;  %v233_v36 = vld [vmem:[#allocation5 + $0x2b8] sm:$0xff]  ;;  %v232_v40 = vld [vmem:[#allocation5 + $0x2b0] sm:$0xff] }
  0x75   :  { %345 = vmatprep.mubr.f32.mxu0 %v139_v63  ;;  %1122 = vmatpush3.msra.mxu1 %v178_v0  ;;  %v250_v35 = vld [vmem:[#allocation5 + $0x340] sm:$0xff]  ;;  %v265_v37 = vld [vmem:[#allocation5 + $0x3b8] sm:$0xff]  ;;  %v264_v41 = vld [vmem:[#allocation5 + $0x3b0] sm:$0xff] }
  0x76   :  { %346 = vmatmul.mubr.f32.vlgmr.msra.gmra.mxu0 %v138_v1  ;;  %415 = vmatprep.mubr.f32.mxu1 %v141_v2  ;;  %v217_v38 = vld [vmem:[#allocation5 + $0x238] sm:$0xff]  ;;  %v216_v42 = vld [vmem:[#allocation5 + $0x230] sm:$0xff]  ;;  %v231_v44 = vld [vmem:[#allocation5 + $0x2a8] sm:$0xff] }
  0x77   :  { %1126 = vmatprep.subr.mxu0 %v241_v3  ;;  %1161 = vmatprep.subr.mxu1 %v273_v4  ;;  %v249_v39 = vld [vmem:[#allocation5 + $0x338] sm:$0xff]  ;;  %v248_v43 = vld [vmem:[#allocation5 + $0x330] sm:$0xff]  ;;  %v263_v45 = vld [vmem:[#allocation5 + $0x3a8] sm:$0xff] }
  0x78   :  { %416 = vmatmul.mubr.f32.vlgmr.msra.gmra.mxu1 %v140_v5  ;;  %1127 = vmatpush3.msra.mxu0 %v225_v6  ;;  %v215_v46 = vld [vmem:[#allocation5 + $0x228] sm:$0xff]  ;;  %v230_v48 = vld [vmem:[#allocation5 + $0x2a0] sm:$0xff]  ;;  %v229_v52 = vld [vmem:[#allocation5 + $0x298] sm:$0xff] }
  0x79   :  { %1162 = vmatpush3.msra.mxu1 %v257_v7  ;;  %1128 = vmatprep.subr.mxu0 %v240_v8  ;;  %v247_v47 = vld [vmem:[#allocation5 + $0x328] sm:$0xff]  ;;  %v262_v49 = vld [vmem:[#allocation5 + $0x3a0] sm:$0xff]  ;;  %v261_v53 = vld [vmem:[#allocation5 + $0x398] sm:$0xff] }
  0x7a   :  { %1163 = vmatprep.subr.mxu1 %v272_v9  ;;  %1129 = vmatpush3.msra.mxu0 %v224_v10  ;;  %v214_v50 = vld [vmem:[#allocation5 + $0x220] sm:$0xff]  ;;  %v213_v54 = vld [vmem:[#allocation5 + $0x218] sm:$0xff]  ;;  %v228_v56 = vld [vmem:[#allocation5 + $0x290] sm:$0xff]  ;;  %v1647_v9 = vmov 0.0  }
  0x7b   :  { %1164 = vmatpush3.msra.mxu1 %v256_v11  ;;  %1130 = vmatprep.subr.mxu0 %v239_v12  ;;  %v246_v51 = vld [vmem:[#allocation5 + $0x320] sm:$0xff]  ;;  %v245_v55 = vld [vmem:[#allocation5 + $0x318] sm:$0xff]  ;;  %v260_v57 = vld [vmem:[#allocation5 + $0x390] sm:$0xff] }
  0x7c   :  { %1165 = vmatprep.subr.mxu1 %v271_v13  ;;  %1131 = vmatpush3.msra.mxu0 %v223_v14  ;;  %v212_v58 = vld [vmem:[#allocation5 + $0x210] sm:$0xff]  ;;  %v227_v60 = vld [vmem:[#allocation5 + $0x288] sm:$0xff]  ;;  %v226_v0 = vld [vmem:[#allocation5 + $0x280] sm:$0xff] }
  0x7d   :  { %1166 = vmatpush3.msra.mxu1 %v255_v15  ;;  %1132 = vmatprep.subr.mxu0 %v238_v16  ;;  %v244_v59 = vld [vmem:[#allocation5 + $0x310] sm:$0xff]  ;;  %v259_v61 = vld [vmem:[#allocation5 + $0x388] sm:$0xff]  ;;  %v258_v1 = vld [vmem:[#allocation5 + $0x380] sm:$0xff] }
  0x7e   :  { %1167 = vmatprep.subr.mxu1 %v270_v17  ;;  %1133 = vmatpush3.msra.mxu0 %v222_v18  ;;  %v211_v62 = vld [vmem:[#allocation5 + $0x208] sm:$0xff]  ;;  %v210_v2 = vld [vmem:[#allocation5 + $0x200] sm:$0xff]  ;;  %v145_v5 = vld [vmem:[#allocation2 + $0x38] sm:$0xff] }
  0x7f   :  { %1168 = vmatpush3.msra.mxu1 %v254_v19  ;;  %1134 = vmatprep.subr.mxu0 %v237_v20  ;;  %v243_v63 = vld [vmem:[#allocation5 + $0x308] sm:$0xff]  ;;  %v242_v4 = vld [vmem:[#allocation5 + $0x300] sm:$0xff]  ;;  %v144_v7 = vld [vmem:[#allocation2 + $0x30] sm:$0xff] }
  0x80   :  { %1169 = vmatprep.subr.mxu1 %v269_v21  ;;  %1135 = vmatpush3.msra.mxu0 %v221_v22  ;;  %v143_v3 = vld [vmem:[#allocation2 + $0x28] sm:$0xff]  ;;  %v142_v6 = vld [vmem:[#allocation2 + $0x20] sm:$0xff]  ;;  %v577_v8 = vld [vmem:[#allocation7 + $0x78] sm:$0xff] }
  0x81   :  { %1170 = vmatpush3.msra.mxu1 %v253_v23  ;;  %1136 = vmatprep.subr.mxu0 %v236_v24  ;;  %v576_v10 = vld [vmem:[#allocation7 + $0x70] sm:$0xff]  ;;  %v575_v11 = vld [vmem:[#allocation7 + $0x68] sm:$0xff]  ;;  %v574_v12 = vld [vmem:[#allocation7 + $0x60] sm:$0xff] }
  0x82   :  { %1171 = vmatprep.subr.mxu1 %v268_v25  ;;  %1137 = vmatpush3.msra.mxu0 %v220_v26  ;;  %v573_v13 = vld [vmem:[#allocation7 + $0x58] sm:$0xff]  ;;  %v572_v14 = vld [vmem:[#allocation7 + $0x50] sm:$0xff]  ;;  %v571_v15 = vld [vmem:[#allocation7 + $0x48] sm:$0xff] }
  0x83   :  { %1172 = vmatpush3.msra.mxu1 %v252_v27  ;;  %1138 = vmatprep.subr.mxu0 %v235_v28  ;;  %v570_v16 = vld [vmem:[#allocation7 + $0x40] sm:$0xff]  ;;  %v569_v17 = vld [vmem:[#allocation7 + $0x38] sm:$0xff]  ;;  %v568_v18 = vld [vmem:[#allocation7 + $0x30] sm:$0xff] }
  0x84   :  { %1173 = vmatprep.subr.mxu1 %v267_v29  ;;  %1139 = vmatpush3.msra.mxu0 %v219_v30  ;;  %v567_v19 = vld [vmem:[#allocation7 + $0x28] sm:$0xff]  ;;  %v566_v20 = vld [vmem:[#allocation7 + $0x20] sm:$0xff]  ;;  %v565_v21 = vld [vmem:[#allocation7 + $0x18] sm:$0xff] }
  0x85   :  { %1174 = vmatpush3.msra.mxu1 %v251_v31  ;;  %1140 = vmatprep.subr.mxu0 %v234_v32  ;;  %v564_v22 = vld [vmem:[#allocation7 + $0x10] sm:$0xff]  ;;  %v563_v23 = vld [vmem:[#allocation7 + $0x8] sm:$0xff]  ;;  %v562_v24 = vld [vmem:[#allocation7] sm:$0xff] }
  0x86   :  { %1175 = vmatprep.subr.mxu1 %v266_v33  ;;  %1141 = vmatpush3.msra.mxu0 %v218_v34  ;;  %v671_v25 = vld [vmem:[#allocation8 + $0x78] sm:$0xff]  ;;  %v670_v26 = vld [vmem:[#allocation8 + $0x70] sm:$0xff]  ;;  %v669_v27 = vld [vmem:[#allocation8 + $0x68] sm:$0xff] }
  0x87   :  { %1176 = vmatpush3.msra.mxu1 %v250_v35  ;;  %1142 = vmatprep.subr.mxu0 %v233_v36  ;;  %v668_v28 = vld [vmem:[#allocation8 + $0x60] sm:$0xff]  ;;  %v667_v29 = vld [vmem:[#allocation8 + $0x58] sm:$0xff]  ;;  %v666_v30 = vld [vmem:[#allocation8 + $0x50] sm:$0xff] }
  0x88   :  { %1177 = vmatprep.subr.mxu1 %v265_v37  ;;  %1143 = vmatpush3.msra.mxu0 %v217_v38  ;;  %v665_v31 = vld [vmem:[#allocation8 + $0x48] sm:$0xff]  ;;  %v664_v32 = vld [vmem:[#allocation8 + $0x40] sm:$0xff]  ;;  %v663_v33 = vld [vmem:[#allocation8 + $0x38] sm:$0xff] }
  0x89   :  { %1178 = vmatpush3.msra.mxu1 %v249_v39  ;;  %1144 = vmatprep.subr.mxu0 %v232_v40  ;;  %v662_v34 = vld [vmem:[#allocation8 + $0x30] sm:$0xff]  ;;  %v661_v35 = vld [vmem:[#allocation8 + $0x28] sm:$0xff]  ;;  %v660_v36 = vld [vmem:[#allocation8 + $0x20] sm:$0xff] }
  0x8a   :  { %1179 = vmatprep.subr.mxu1 %v264_v41  ;;  %1145 = vmatpush3.msra.mxu0 %v216_v42  ;;  %v659_v37 = vld [vmem:[#allocation8 + $0x18] sm:$0xff]  ;;  %v1050_v42 = vld [vmem:[%s1872_s2] ss:$0 sm:$0xff] }
  0x8b   :  { %1180 = vmatpush3.msra.mxu1 %v248_v43  ;;  %1146 = vmatprep.subr.mxu0 %v231_v44 }
  0x8c   :  { %1181 = vmatprep.subr.mxu1 %v263_v45  ;;  %1147 = vmatpush3.msra.mxu0 %v215_v46 }
  0x8d   :  { %1182 = vmatpush3.msra.mxu1 %v247_v47  ;;  %1148 = vmatprep.subr.mxu0 %v230_v48 }
  0x8e   :  { %1183 = vmatprep.subr.mxu1 %v262_v49  ;;  %1149 = vmatpush3.msra.mxu0 %v214_v50 }
  0x8f   :  { %1184 = vmatpush3.msra.mxu1 %v246_v51  ;;  %1150 = vmatprep.subr.mxu0 %v229_v52 }
  0x90   :  { %1185 = vmatprep.subr.mxu1 %v261_v53  ;;  %1151 = vmatpush3.msra.mxu0 %v213_v54 }
  0x91   :  { %1186 = vmatpush3.msra.mxu1 %v245_v55  ;;  %1152 = vmatprep.subr.mxu0 %v228_v56  ;;  %v658_v56 = vld [vmem:[#allocation8 + $0x10] sm:$0xff] }
  0x92   :  { %1187 = vmatprep.subr.mxu1 %v260_v57  ;;  %1153 = vmatpush3.msra.mxu0 %v212_v58  ;;  %v657_v57 = vld [vmem:[#allocation8 + $0x8] sm:$0xff]  ;;  %v656_v58 = vld [vmem:[#allocation8] sm:$0xff] }
  0x93   :  { %1188 = vmatpush3.msra.mxu1 %v244_v59  ;;  %1154 = vmatprep.subr.mxu0 %v227_v60  ;;  %v765_v59 = vld [vmem:[#allocation10 + $0x78] sm:$0xff]  ;;  %v764_v60 = vld [vmem:[#allocation10 + $0x70] sm:$0xff] }
  0x94   :  { %1189 = vmatprep.subr.mxu1 %v259_v61  ;;  %1155 = vmatpush3.msra.mxu0 %v211_v62  ;;  %v763_v61 = vld [vmem:[#allocation10 + $0x68] sm:$0xff]  ;;  %v762_v62 = vld [vmem:[#allocation10 + $0x60] sm:$0xff] }
  0x95   :  { %1190 = vmatpush3.msra.mxu1 %v243_v63  ;;  %1156 = vmatprep.subr.mxu0 %v226_v0  ;;  %v761_v63 = vld [vmem:[#allocation10 + $0x58] sm:$0xff]  ;;  %v760_v0 = vld [vmem:[#allocation10 + $0x50] sm:$0xff] }
  0x96   :  { %1191 = vmatprep.subr.mxu1 %v258_v1  ;;  %1157 = vmatpush3.msra.mxu0 %v210_v2  ;;  %v759_v1 = vld [vmem:[#allocation10 + $0x48] sm:$0xff]  ;;  %v758_v2 = vld [vmem:[#allocation10 + $0x40] sm:$0xff] }
  0x97   :  { %485 = vmatprep.mubr.f32.mxu0 %v143_v3  ;;  %1192 = vmatpush3.msra.mxu1 %v242_v4  ;;  %v757_v3 = vld [vmem:[#allocation10 + $0x38] sm:$0xff]  ;;  %v756_v4 = vld [vmem:[#allocation10 + $0x30] sm:$0xff] }
  0x98   :  { %555 = vmatprep.mubr.f32.mxu1 %v145_v5  ;;  %486 = vmatmul.mubr.f32.vlgmr.msra.gmra.mxu0 %v142_v6  ;;  %v755_v5 = vld [vmem:[#allocation10 + $0x28] sm:$0xff]  ;;  %v754_v6 = vld [vmem:[#allocation10 + $0x20] sm:$0xff] }
  0x99   :  { %556 = vmatmul.mubr.f32.vlgmr.msra.gmra.mxu1 %v144_v7  ;;  %1281 = vmatprep.subr.mxu0 %v1647_v9  ;;  %v753_v7 = vld [vmem:[#allocation10 + $0x18] sm:$0xff] }
  0x9a   :  { %1316 = vmatprep.subr.mxu1 %v1647_v9  ;;  %1282 = vmatpush3.msra.mxu0 %v577_v8  ;;  %v1051_v8 = vld [vmem:[%s1874_s4] ss:$0 sm:$0xff] }
  0x9b   :  { %1283 = vmatprep.subr.mxu0 %v1647_v9  ;;  %1313 = vmatprep.mubr.msk.f32.mxu0 %vm1648_vm0, %v1647_v9 }
  0x9c   :  { %1284 = vmatpush3.msra.mxu0 %v576_v10  ;;  %1348 = vmatprep.mubr.msk.f32.mxu1 %vm1648_vm0, %v1647_v9 }
  0x9d   :  { %1285 = vmatprep.subr.mxu0 %v1647_v9  ;;  %1317 = vmatpush3.msra.mxu1 %v671_v25  ;;  %v851_v25 = vld [vmem:[#allocation11 + $0x38] sm:$0xff] }
  0x9e   :  { %1286 = vmatpush3.msra.mxu0 %v575_v11  ;;  %1318 = vmatprep.subr.mxu1 %v1647_v9 }
  0x9f   :  { %1287 = vmatprep.subr.mxu0 %v1647_v9  ;;  %1319 = vmatpush3.msra.mxu1 %v670_v26  ;;  %v850_v26 = vld [vmem:[#allocation11 + $0x30] sm:$0xff] }
  0xa0   :  { %1288 = vmatpush3.msra.mxu0 %v574_v12  ;;  %1320 = vmatprep.subr.mxu1 %v1647_v9 }
  0xa1   :  { %1289 = vmatprep.subr.mxu0 %v1647_v9  ;;  %1321 = vmatpush3.msra.mxu1 %v669_v27  ;;  %v849_v27 = vld [vmem:[#allocation11 + $0x28] sm:$0xff] }
  0xa2   :  { %1290 = vmatpush3.msra.mxu0 %v573_v13  ;;  %1322 = vmatprep.subr.mxu1 %v1647_v9 }
  0xa3   :  { %1291 = vmatprep.subr.mxu0 %v1647_v9  ;;  %1323 = vmatpush3.msra.mxu1 %v668_v28  ;;  %v848_v28 = vld [vmem:[#allocation11 + $0x20] sm:$0xff] }
  0xa4   :  { %1292 = vmatpush3.msra.mxu0 %v572_v14  ;;  %1324 = vmatprep.subr.mxu1 %v1647_v9  ;;  %v752_v14 = vld [vmem:[#allocation10 + $0x10] sm:$0xff] }
  0xa5   :  { %1293 = vmatprep.subr.mxu0 %v1647_v9  ;;  %1325 = vmatpush3.msra.mxu1 %v667_v29  ;;  %v847_v29 = vld [vmem:[#allocation11 + $0x18] sm:$0xff] }
  0xa6   :  { %1294 = vmatpush3.msra.mxu0 %v571_v15  ;;  %1326 = vmatprep.subr.mxu1 %v1647_v9  ;;  %v751_v15 = vld [vmem:[#allocation10 + $0x8] sm:$0xff] }
  0xa7   :  { %1295 = vmatprep.subr.mxu0 %v1647_v9  ;;  %1327 = vmatpush3.msra.mxu1 %v666_v30  ;;  %v1052_v30 = vld [vmem:[%s1876_s6] ss:$0 sm:$0xff] }
  0xa8   :  { %1296 = vmatpush3.msra.mxu0 %v570_v16  ;;  %1328 = vmatprep.subr.mxu1 %v1647_v9  ;;  %v750_v16 = vld [vmem:[#allocation10] sm:$0xff] }
  0xa9   :  { %1297 = vmatprep.subr.mxu0 %v1647_v9  ;;  %1329 = vmatpush3.msra.mxu1 %v665_v31 }
  0xaa   :  { %1298 = vmatpush3.msra.mxu0 %v569_v17  ;;  %1330 = vmatprep.subr.mxu1 %v1647_v9  ;;  %v859_v17 = vld [vmem:[#allocation11 + $0x78] sm:$0xff] }
  0xab   :  { %1299 = vmatprep.subr.mxu0 %v1647_v9  ;;  %1331 = vmatpush3.msra.mxu1 %v664_v32 }
  0xac   :  { %1300 = vmatpush3.msra.mxu0 %v568_v18  ;;  %1332 = vmatprep.subr.mxu1 %v1647_v9  ;;  %v858_v18 = vld [vmem:[#allocation11 + $0x70] sm:$0xff] }
  0xad   :  { %1301 = vmatprep.subr.mxu0 %v1647_v9  ;;  %1333 = vmatpush3.msra.mxu1 %v663_v33 }
  0xae   :  { %1302 = vmatpush3.msra.mxu0 %v567_v19  ;;  %1334 = vmatprep.subr.mxu1 %v1647_v9  ;;  %v857_v19 = vld [vmem:[#allocation11 + $0x68] sm:$0xff] }
  0xaf   :  { %1303 = vmatprep.subr.mxu0 %v1647_v9  ;;  %1335 = vmatpush3.msra.mxu1 %v662_v34 }
  0xb0   :  { %1304 = vmatpush3.msra.mxu0 %v566_v20  ;;  %1336 = vmatprep.subr.mxu1 %v1647_v9  ;;  %v856_v20 = vld [vmem:[#allocation11 + $0x60] sm:$0xff] }
  0xb1   :  { %1305 = vmatprep.subr.mxu0 %v1647_v9  ;;  %1337 = vmatpush3.msra.mxu1 %v661_v35  ;;  %v846_v35 = vld [vmem:[#allocation11 + $0x10] sm:$0xff] }
  0xb2   :  { %1306 = vmatpush3.msra.mxu0 %v565_v21  ;;  %1338 = vmatprep.subr.mxu1 %v1647_v9  ;;  %v855_v21 = vld [vmem:[#allocation11 + $0x58] sm:$0xff] }
  0xb3   :  { %1307 = vmatprep.subr.mxu0 %v1647_v9  ;;  %1339 = vmatpush3.msra.mxu1 %v660_v36  ;;  %v845_v36 = vld [vmem:[#allocation11 + $0x8] sm:$0xff] }
  0xb4   :  { %1308 = vmatpush3.msra.mxu0 %v564_v22  ;;  %1340 = vmatprep.subr.mxu1 %v1647_v9  ;;  %v854_v22 = vld [vmem:[#allocation11 + $0x50] sm:$0xff] }
  0xb5   :  { %1309 = vmatprep.subr.mxu0 %v1647_v9  ;;  %1341 = vmatpush3.msra.mxu1 %v659_v37  ;;  %v844_v37 = vld [vmem:[#allocation11] sm:$0xff] }
  0xb6   :  { %1310 = vmatpush3.msra.mxu0 %v563_v23  ;;  %1342 = vmatprep.subr.mxu1 %v1647_v9  ;;  %v853_v23 = vld [vmem:[#allocation11 + $0x48] sm:$0xff] }
  0xb7   :  { %1311 = vmatprep.subr.mxu0 %v1647_v9  ;;  %1343 = vmatpush3.msra.mxu1 %v658_v56  ;;  %v940_v56 = vld [vmem:[#allocation13 + $0x10] sm:$0xff] }
  0xb8   :  { %1312 = vmatpush3.msra.mxu0 %v562_v24  ;;  %1344 = vmatprep.subr.mxu1 %v1647_v9  ;;  %v852_v24 = vld [vmem:[#allocation11 + $0x40] sm:$0xff] }
  0xb9   :  { %1351 = vmatprep.subr.mxu0 %v1647_v9  ;;  %1345 = vmatpush3.msra.mxu1 %v657_v57  ;;  %v939_v57 = vld [vmem:[#allocation13 + $0x8] sm:$0xff] }
  0xba   :  { %1346 = vmatprep.subr.mxu1 %v1647_v9 }
  0xbb   :  { %1347 = vmatpush3.msra.mxu1 %v656_v58  ;;  %v938_v58 = vld [vmem:[#allocation13] sm:$0xff] }
  0xbc   :  { %1386 = vmatprep.subr.mxu1 %v1647_v9 }
 0x136   :  { %v1088_v38 = vpop.f32.mrf.mxu0 }
 0x138   :  { %v1123_v39 = vpop.f32.mrf.mxu1  ;;  %v1089_v40 = vpop.f32.mrf.mxu0 }
 0x139   :  { %v1090_v41 = vadd.f32 %v1089_v40, %v1088_v38  ;;  %v953_v38 = vld [vmem:[#allocation13 + $0x78] sm:$0xff]  ;;  %v951_v40 = vld [vmem:[#allocation13 + $0x68] sm:$0xff] }
 0x13a   :  { %v1124_v43 = vpop.f32.mrf.mxu1 }
 0x13b   :  { %v348_v44 = vadd.f32 %v1090_v41, %v1050_v42  ;;  %v1125_v45 = vadd.f32 %v1124_v43, %v1123_v39  ;;  %v952_v39 = vld [vmem:[#allocation13 + $0x70] sm:$0xff]  ;;  %v950_v41 = vld [vmem:[#allocation13 + $0x60] sm:$0xff]  ;;  %v949_v42 = vld [vmem:[#allocation13 + $0x58] sm:$0xff] }
 0x13c   :  { %v948_v43 = vld [vmem:[#allocation13 + $0x50] sm:$0xff] }
 0x13d   :  { %v418_v50 = vadd.f32 %v1125_v45, %v348_v44  ;;  %v947_v44 = vld [vmem:[#allocation13 + $0x48] sm:$0xff]  ;;  %v946_v45 = vld [vmem:[#allocation13 + $0x40] sm:$0xff] }
 0x158   :  { %v1158_v46 = vpop.f32.mrf.mxu0 }
 0x159   :  { %v1193_v47 = vpop.f32.mrf.mxu1 }
 0x15a   :  { %v1159_v48 = vpop.f32.mrf.mxu0 }
 0x15b   :  { %v1194_v49 = vpop.f32.mrf.mxu1  ;;  %v1160_v51 = vadd.f32 %v1159_v48, %v1158_v46  ;;  %v945_v46 = vld [vmem:[#allocation13 + $0x38] sm:$0xff]  ;;  %v943_v48 = vld [vmem:[#allocation13 + $0x28] sm:$0xff] }
 0x15c   :  { %v1195_v53 = vadd.f32 %v1194_v49, %v1193_v47  ;;  %v944_v47 = vld [vmem:[#allocation13 + $0x30] sm:$0xff]  ;;  %v942_v49 = vld [vmem:[#allocation13 + $0x20] sm:$0xff] }
 0x15d   :  { %v488_v52 = vadd.f32 %v1160_v51, %v418_v50  ;;  %v941_v50 = vld [vmem:[#allocation13 + $0x18] sm:$0xff]  ;;  %v1053_v51 = vld [vmem:[%s1878_s8] ss:$0 sm:$0xff] }
 0x15f   :  { %v558_v54 = vadd.f32 %v1195_v53, %v488_v52 }
 0x161   :  { %v561_v55 = vmax.f32 %v558_v54, 0.0 }
 0x163   :  { %1314 = vmatmul.mubr.f32.vlgmr.msra.gmra.mxu0 %v561_v55 }
 0x164   :  { %1383 = vmatprep.mubr.msk.f32.mxu0 %vm1648_vm0, %v1647_v9  ;;  %1352 = vmatpush3.msra.mxu0 %v765_v59  ;;  %v1054_v59 = vld [vmem:[%s1880_s10] ss:$0 sm:$0xff] }
 0x165   :  { %1353 = vmatprep.subr.mxu0 %v1647_v9 }
 0x166   :  { %1354 = vmatpush3.msra.mxu0 %v764_v60 }
 0x167   :  { %1355 = vmatprep.subr.mxu0 %v1647_v9 }
 0x168   :  { %1356 = vmatpush3.msra.mxu0 %v763_v61 }
 0x169   :  { %1357 = vmatprep.subr.mxu0 %v1647_v9 }
 0x16a   :  { %1358 = vmatpush3.msra.mxu0 %v762_v62 }
 0x16b   :  { %1359 = vmatprep.subr.mxu0 %v1647_v9 }
 0x16c   :  { %1360 = vmatpush3.msra.mxu0 %v761_v63 }
 0x16d   :  { %1361 = vmatprep.subr.mxu0 %v1647_v9 }
 0x16e   :  { %1362 = vmatpush3.msra.mxu0 %v760_v0  ;;  %v1055_v0 = vld [vmem:[%s1882_s12] ss:$0 sm:$0xff] }
 0x16f   :  { %1363 = vmatprep.subr.mxu0 %v1647_v9 }
 0x170   :  { %1364 = vmatpush3.msra.mxu0 %v759_v1 }
 0x171   :  { %1365 = vmatprep.subr.mxu0 %v1647_v9 }
 0x172   :  { %1366 = vmatpush3.msra.mxu0 %v758_v2 }
 0x173   :  { %1367 = vmatprep.subr.mxu0 %v1647_v9 }
 0x174   :  { %1368 = vmatpush3.msra.mxu0 %v757_v3 }
 0x175   :  { %1369 = vmatprep.subr.mxu0 %v1647_v9 }
 0x176   :  { %1370 = vmatpush3.msra.mxu0 %v756_v4 }
 0x177   :  { %1371 = vmatprep.subr.mxu0 %v1647_v9 }
 0x178   :  { %1372 = vmatpush3.msra.mxu0 %v755_v5 }
 0x179   :  { %1373 = vmatprep.subr.mxu0 %v1647_v9 }
 0x17a   :  { %1374 = vmatpush3.msra.mxu0 %v754_v6 }
 0x17b   :  { %1375 = vmatprep.subr.mxu0 %v1647_v9 }
 0x17c   :  { %1376 = vmatpush3.msra.mxu0 %v753_v7 }
 0x17d   :  { %1377 = vmatprep.subr.mxu0 %v1647_v9 }
 0x17e   :  { %1378 = vmatpush3.msra.mxu0 %v752_v14 }
 0x17f   :  { %1379 = vmatprep.subr.mxu0 %v1647_v9 }
 0x180   :  { %1380 = vmatpush3.msra.mxu0 %v751_v15 }
 0x181   :  { %1381 = vmatprep.subr.mxu0 %v1647_v9 }
 0x182   :  { %1382 = vmatpush3.msra.mxu0 %v750_v16 }
 0x183   :  { %1421 = vmatprep.subr.mxu0 %v1647_v9 }
 0x223   :  { %v651_v10 = vpop.f32.mrf.mxu0 }
 0x224   :  { %v652_v11 = vadd.f32 %v1051_v8, %v651_v10 }
 0x225   :  { %v1315_v12 = vpop.f32.mrf.mxu0 }
 0x226   :  { %v655_v13 = vmax.f32 %v652_v11, 0.0 }
 0x228   :  { %1349 = vmatmul.mubr.f32.vlgmr.msra.gmra.mxu1 %v655_v13 }
 0x229   :  { %1418 = vmatprep.mubr.msk.f32.mxu1 %vm1648_vm0, %v1647_v9  ;;  %1387 = vmatpush3.msra.mxu1 %v859_v17 }
 0x22a   :  { %1388 = vmatprep.subr.mxu1 %v1647_v9 }
 0x22b   :  { %1389 = vmatpush3.msra.mxu1 %v858_v18 }
 0x22c   :  { %1390 = vmatprep.subr.mxu1 %v1647_v9 }
 0x22d   :  { %1391 = vmatpush3.msra.mxu1 %v857_v19 }
 0x22e   :  { %1392 = vmatprep.subr.mxu1 %v1647_v9 }
 0x22f   :  { %1393 = vmatpush3.msra.mxu1 %v856_v20 }
 0x230   :  { %1394 = vmatprep.subr.mxu1 %v1647_v9 }
 0x231   :  { %1395 = vmatpush3.msra.mxu1 %v855_v21 }
 0x232   :  { %1396 = vmatprep.subr.mxu1 %v1647_v9 }
 0x233   :  { %1397 = vmatpush3.msra.mxu1 %v854_v22 }
 0x234   :  { %1398 = vmatprep.subr.mxu1 %v1647_v9 }
 0x235   :  { %1399 = vmatpush3.msra.mxu1 %v853_v23 }
 0x236   :  { %1400 = vmatprep.subr.mxu1 %v1647_v9 }
 0x237   :  { %1401 = vmatpush3.msra.mxu1 %v852_v24 }
 0x238   :  { %1402 = vmatprep.subr.mxu1 %v1647_v9 }
 0x239   :  { %1403 = vmatpush3.msra.mxu1 %v851_v25 }
 0x23a   :  { %1404 = vmatprep.subr.mxu1 %v1647_v9 }
 0x23b   :  { %1405 = vmatpush3.msra.mxu1 %v850_v26 }
 0x23c   :  { %1406 = vmatprep.subr.mxu1 %v1647_v9 }
 0x23d   :  { %1407 = vmatpush3.msra.mxu1 %v849_v27 }
 0x23e   :  { %1408 = vmatprep.subr.mxu1 %v1647_v9 }
 0x23f   :  { %1409 = vmatpush3.msra.mxu1 %v848_v28 }
 0x240   :  { %1410 = vmatprep.subr.mxu1 %v1647_v9 }
 0x241   :  { %1411 = vmatpush3.msra.mxu1 %v847_v29 }
 0x242   :  { %1412 = vmatprep.subr.mxu1 %v1647_v9 }
 0x243   :  { %1413 = vmatpush3.msra.mxu1 %v846_v35 }
 0x244   :  { %1414 = vmatprep.subr.mxu1 %v1647_v9 }
 0x245   :  { %1415 = vmatpush3.msra.mxu1 %v845_v36 }
 0x246   :  { %1416 = vmatprep.subr.mxu1 %v1647_v9 }
 0x247   :  { %1417 = vmatpush3.msra.mxu1 %v844_v37 }
 0x2e8   :  { %v745_v31 = vpop.f32.mrf.mxu1 }
 0x2e9   :  { %v746_v32 = vadd.f32 %v1052_v30, %v745_v31 }
 0x2ea   :  { %v1350_v33 = vpop.f32.mrf.mxu1 }
 0x2eb   :  { %v749_v34 = vmax.f32 %v746_v32, 0.0 }
 0x2ed   :  { %1384 = vmatmul.mubr.f32.vlgmr.msra.gmra.mxu0 %v749_v34 }
 0x2ee   :  { %1453 = vmatprep.mubr.msk.f32.mxu0 %vm1648_vm0, %v1647_v9  ;;  %1422 = vmatpush3.msra.mxu0 %v953_v38 }
 0x2ef   :  { %1423 = vmatprep.subr.mxu0 %v1647_v9 }
 0x2f0   :  { %1424 = vmatpush3.msra.mxu0 %v952_v39 }
 0x2f1   :  { %1425 = vmatprep.subr.mxu0 %v1647_v9 }
 0x2f2   :  { %1426 = vmatpush3.msra.mxu0 %v951_v40 }
 0x2f3   :  { %1427 = vmatprep.subr.mxu0 %v1647_v9 }
 0x2f4   :  { %1428 = vmatpush3.msra.mxu0 %v950_v41 }
 0x2f5   :  { %1429 = vmatprep.subr.mxu0 %v1647_v9 }
 0x2f6   :  { %1430 = vmatpush3.msra.mxu0 %v949_v42 }
 0x2f7   :  { %1431 = vmatprep.subr.mxu0 %v1647_v9 }
 0x2f8   :  { %1432 = vmatpush3.msra.mxu0 %v948_v43 }
 0x2f9   :  { %1433 = vmatprep.subr.mxu0 %v1647_v9 }
 0x2fa   :  { %1434 = vmatpush3.msra.mxu0 %v947_v44 }
 0x2fb   :  { %1435 = vmatprep.subr.mxu0 %v1647_v9 }
 0x2fc   :  { %1436 = vmatpush3.msra.mxu0 %v946_v45 }
 0x2fd   :  { %1437 = vmatprep.subr.mxu0 %v1647_v9 }
 0x2fe   :  { %1438 = vmatpush3.msra.mxu0 %v945_v46 }
 0x2ff   :  { %1439 = vmatprep.subr.mxu0 %v1647_v9 }
 0x300   :  { %1440 = vmatpush3.msra.mxu0 %v944_v47 }
 0x301   :  { %1441 = vmatprep.subr.mxu0 %v1647_v9 }
 0x302   :  { %1442 = vmatpush3.msra.mxu0 %v943_v48 }
 0x303   :  { %1443 = vmatprep.subr.mxu0 %v1647_v9 }
 0x304   :  { %1444 = vmatpush3.msra.mxu0 %v942_v49 }
 0x305   :  { %1445 = vmatprep.subr.mxu0 %v1647_v9 }
 0x306   :  { %1446 = vmatpush3.msra.mxu0 %v941_v50 }
 0x307   :  { %1447 = vmatprep.subr.mxu0 %v1647_v9 }
 0x308   :  { %1448 = vmatpush3.msra.mxu0 %v940_v56 }
 0x309   :  { %1449 = vmatprep.subr.mxu0 %v1647_v9 }
 0x30a   :  { %1450 = vmatpush3.msra.mxu0 %v939_v57 }
 0x30b   :  { %1451 = vmatprep.subr.mxu0 %v1647_v9 }
 0x30c   :  { %1452 = vmatpush3.msra.mxu0 %v938_v58 }
 0x3ad   :  { %v839_v52 = vpop.f32.mrf.mxu0 }
 0x3ae   :  { %v840_v53 = vadd.f32 %v1053_v51, %v839_v52 }
 0x3af   :  { %v1385_v54 = vpop.f32.mrf.mxu0 }
 0x3b0   :  { %v843_v55 = vmax.f32 %v840_v53, 0.0 }
 0x3b2   :  { %1419 = vmatmul.mubr.f32.vlgmr.msra.gmra.mxu1 %v843_v55 }
 0x472   :  { %v933_v60 = vpop.f32.mrf.mxu1 }
 0x473   :  { %v934_v61 = vadd.f32 %v1054_v59, %v933_v60 }
 0x474   :  { %v1420_v62 = vpop.f32.mrf.mxu1 }
 0x475   :  { %v937_v63 = vmax.f32 %v934_v61, 0.0 }
 0x477   :  { %1454 = vmatmul.mubr.f32.vlgmr.msra.gmra.mxu0 %v937_v63 }
 0x537   :  { %v1027_v1 = vpop.f32.mrf.mxu0 }
 0x538   :  { %v1028_v2 = vadd.f32 %v1055_v0, %v1027_v1 }
 0x539   :  { %v1455_v9 = vpop.f32.mrf.mxu0 }
 0x53a   :  { %1031 = vst [vmem:[#allocation14] sm:$0xff] %v1028_v2 }
 0x53b   :  { %1619 = shalt.err (!%p1616_p11)
}
 0x53c   :  { %1041 = dma.vmem_to_hbm [thread:$0]  %s1039_s30, 128, %s1883_s13, [#allocation4]  }
 0x53d   :  { %1636 = dma.done.wait [#allocation4], 128  }
 0x53e   :  { %1637 = vsyncadd [#allocation4], 4294967168 }
 0x53f   :  { %1045 = vsyncpa [#allocation3], 1 }
 0x540   :  { %1046 = vsyncpa [#allocation6], 1 }
 0x541   :  { %1047 = vsyncpa [#allocation9], 1 }
 0x542   :  { %1048 = vsyncpa [#allocation12], 1 }
 0x543   :  { %1049 = vsyncpa [#allocation4], 1 }

</bundles_post_ra>
